<compile_context>
chip_gen: v5e
topology: v5e:2x2
jax: 0.10.0
libtpu: 0.0.40
codegen_flags: <defaults>
</compile_context>

<pallas_src>
import functools
import math

import jax
import jax.numpy as jnp
from jax.experimental import pallas as pl
from jax.experimental.pallas import tpu as pltpu


def _round_up(n, m):
    return ((n + m - 1) // m) * m


def _layer_norm(x, gamma, beta, eps=1e-5):
    # PyTorch LayerNorm: biased variance over the last axis, eps=1e-5.
    mean = jnp.mean(x, axis=-1, keepdims=True)
    var = jnp.mean(jnp.square(x - mean), axis=-1, keepdims=True)
    return (x - mean) * jax.lax.rsqrt(var + eps) * gamma + beta


# ---------------------------------------------------------------------------
# Fused forward kernel: grid = (batch_tile_index, layer).
# ---------------------------------------------------------------------------
def _fused_forward_kernel(
        x_ref,
        w_in_ref, b_in_ref,
        wqkv_ref, bqkv_ref, wo_ref, bo_ref,
        w1_ref, b1_ref, w2_ref, b2_ref,
        ln1g_ref, ln1b_ref, ln2g_ref, ln2b_ref, ln3g_ref, ln3b_ref,
        w_out_ref, b_out_ref,
        o_ref,
        h_scratch,
        *, num_heads):
    layer = pl.program_id(1)
    n_layers = pl.num_programs(1)
    mm = wqkv_ref.dtype                      # matmul operand dtype (bf16/f32)

    TB, S, H = x_ref.shape
    M, D = h_scratch.shape                   # M = TB * S
    hd = D // num_heads

    # --- input_linear + relu, only on the first layer step of this tile ---
    @pl.when(layer == 0)
    def _():
        y = jnp.dot(x_ref[...].reshape(M, H), w_in_ref[...],
                    preferred_element_type=jnp.float32) + b_in_ref[...]
        h_scratch[...] = jnp.maximum(y, 0.0)

    h = h_scratch[...]                       # (M, D) f32, resident in VMEM

    # --- multi-head self attention: fused QKV projection over the tile ---
    # 1/sqrt(hd) is already folded into the Q columns of wqkv/bqkv.
    qkv = jnp.dot(h.astype(mm), wqkv_ref[...],
                  preferred_element_type=jnp.float32) + bqkv_ref[...]

    # Per-head contexts are accumulated straight through W_O (f32 accumulator,
    # bias added once) — no masked sub-128-lane scratch stores / reloads.
    attn = jnp.broadcast_to(bo_ref[...], (M, D)).astype(jnp.float32)

    # TODO(synk): per-head column slices of qkv at hd-wide lane offsets cost an
    # XLU relayout each; the alternative (one (TB,S,nh,hd)->(TB,nh,S,hd)
    # transpose per layer) relies on a sublane transpose Mosaic may not lower,
    # so the proven-to-compile slicing form is kept.
    # TODO(synk): for S >~ 512, tile the key axis with an online softmax so the
    # per-head (TB, S, S) f32 score temporary stays bounded.
    for hix in range(num_heads):             # static unroll over heads
        lo = hix * hd
        q_h = qkv[:, lo:lo + hd].astype(mm).reshape(TB, S, hd)
        k_h = qkv[:, D + lo:D + lo + hd].astype(mm).reshape(TB, S, hd)
        v_h = qkv[:, 2 * D + lo:2 * D + lo + hd].astype(mm).reshape(TB, S, hd)

        # NT matmul per sequence in the tile (transpose folds into MXU layout)
        s = jnp.einsum('bqd,bkd->bqk', q_h, k_h,
                       preferred_element_type=jnp.float32)        # (TB,S,S) f32
        s = s - jnp.max(s, axis=-1, keepdims=True)
        p = jnp.exp(s)
        p = p * pl.reciprocal(jnp.sum(p, axis=-1, keepdims=True), approx=True)
        ctx = jnp.einsum('bqk,bkd->bqd', p.astype(mm), v_h,
                         preferred_element_type=jnp.float32)      # (TB,S,hd)
        attn = attn + jnp.dot(ctx.reshape(M, hd).astype(mm),
                              wo_ref[lo:lo + hd, :],
                              preferred_element_type=jnp.float32)

    # residual + norm1 (post-norm, dropout = 0)
    h = _layer_norm(h + attn, ln1g_ref[...], ln1b_ref[...])

    # --- feed forward: linear1 -> relu -> linear2 (intermediate kept bf16) ---
    ff = jnp.dot(h.astype(mm), w1_ref[...],
                 preferred_element_type=jnp.float32) + b1_ref[...]
    ff = jnp.maximum(ff, 0.0).astype(mm)
    ff = jnp.dot(ff, w2_ref[...],
                 preferred_element_type=jnp.float32) + b2_ref[...]

    # residual + norm2, then the extra per-layer LayerNorm (self.layer_norms[i])
    h = _layer_norm(h + ff, ln2g_ref[...], ln2b_ref[...])
    h = _layer_norm(h, ln3g_ref[...], ln3b_ref[...])
    h_scratch[...] = h

    # --- output head, only on the last layer step (lane-dense padded width) ---
    @pl.when(layer == n_layers - 1)
    def _():
        out = jnp.dot(h.astype(mm), w_out_ref[...],
                      preferred_element_type=jnp.float32) + b_out_ref[...]
        o_ref[...] = out.reshape(TB, S, -1).astype(o_ref.dtype)


# ---------------------------------------------------------------------------
# Parameter init (deterministic, PyTorch-Linear-like uniform fan-in init).
# Weights stored as (in, out); per-layer params stacked with a leading L axis.
# TODO(synk): torch uses xavier_uniform_ for MHA in_proj; only matters when
# importing a torch checkpoint, not for kernel correctness/perf.
# ---------------------------------------------------------------------------
def init_params(key, hidden_size, d_model, ff_dim, num_layers, output_dim):
    def uniform(k, shape, fan_in):
        lim = 1.0 / math.sqrt(fan_in)
        return jax.random.uniform(k, shape, jnp.float32, -lim, lim)

    keys = iter(jax.random.split(key, 4 + 8 * num_layers))
    p = {}
    p["w_in"] = uniform(next(keys), (hidden_size, d_model), hidden_size)
    p["b_in"] = uniform(next(keys), (1, d_model), hidden_size)
    p["w_out"] = uniform(next(keys), (d_model, output_dim), d_model)
    p["b_out"] = uniform(next(keys), (1, output_dim), d_model)

    wqkv, bqkv, wo, bo, w1, b1, w2, b2 = ([] for _ in range(8))
    for _ in range(num_layers):
        wqkv.append(uniform(next(keys), (d_model, 3 * d_model), d_model))
        bqkv.append(uniform(next(keys), (1, 3 * d_model), d_model))
        wo.append(uniform(next(keys), (d_model, d_model), d_model))
        bo.append(uniform(next(keys), (1, d_model), d_model))
        w1.append(uniform(next(keys), (d_model, ff_dim), d_model))
        b1.append(uniform(next(keys), (1, ff_dim), d_model))
        w2.append(uniform(next(keys), (ff_dim, d_model), ff_dim))
        b2.append(uniform(next(keys), (1, d_model), ff_dim))

    p["wqkv"] = jnp.stack(wqkv)
    p["bqkv"] = jnp.stack(bqkv)
    p["wo"] = jnp.stack(wo)
    p["bo"] = jnp.stack(bo)
    p["w1"] = jnp.stack(w1)
    p["b1"] = jnp.stack(b1)
    p["w2"] = jnp.stack(w2)
    p["b2"] = jnp.stack(b2)

    ones = jnp.ones((num_layers, 1, d_model), jnp.float32)
    zeros = jnp.zeros((num_layers, 1, d_model), jnp.float32)
    for nm in ("ln1", "ln2", "ln3"):
        p[nm + "_g"] = ones
        p[nm + "_b"] = zeros
    return p


# ---------------------------------------------------------------------------
# Batch-tile sizing from a per-chip VMEM budget (re-derived for v7x's 64 MiB).
# ---------------------------------------------------------------------------
def _pick_batch_tile(B, S, H, D, F, O_pad, mm_bytes, budget_bytes):
    f32 = 4
    # per-layer streamed weights, double-buffered by the pipeline
    layer_w = ((3 * D * D + D * D + D * F + F * D) * mm_bytes
               + (3 * D + 2 * D + F + 6 * D) * f32)
    const_w = (H * D + D * O_pad) * mm_bytes + (D + O_pad) * f32
    fixed = 2 * layer_w + const_w
    for tb in range(min(B, 64), 0, -1):
        M = tb * S
        act = (M * D * f32                        # resident activation scratch
               + 2 * M * H * mm_bytes             # x blocks (double-buffered)
               + 2 * M * O_pad * f32              # output blocks
               + M * 3 * D * (f32 + mm_bytes)     # qkv f32 + bf16 casts
               + 2 * M * D * f32                  # attn accumulator / residual
               + M * F * (f32 + mm_bytes)         # FF intermediate
               + 2 * tb * S * S * f32)            # per-head scores / probs
        if fixed + act <= budget_bytes:
            return tb
    return 1


# ---------------------------------------------------------------------------
# Full forward, mirroring TransformerEnsembler.forward — ONE pallas_call.
# ---------------------------------------------------------------------------
def transformer_ensembler(x, params, num_heads, matmul_dtype=jnp.bfloat16,
                          batch_tile=None):
    B, S, H = x.shape
    D = params["w_in"].shape[1]
    F = params["w1"].shape[2]
    L = params["wqkv"].shape[0]
    O = params["w_out"].shape[1]
    O_pad = _round_up(O, 128)                # lane-dense output width
    mm_bytes = jnp.dtype(matmul_dtype).itemsize

    # Explicit VMEM limit from the actual chip (128 MiB v5e/v6e, 64 MiB v7x).
    try:
        vmem_cap = int(getattr(pltpu.get_tpu_info(), "vmem_capacity_bytes",
                               64 * 1024 * 1024))
    except Exception:
        vmem_cap = 64 * 1024 * 1024
    vmem_limit = int(vmem_cap * 0.85)

    if batch_tile is None:
        batch_tile = _pick_batch_tile(B, S, H, D, F, O_pad, mm_bytes,
                                      int(vmem_limit * 0.8))
    TB = max(1, min(int(batch_tile), B))
    n_bt = -(-B // TB)
    B_pad = n_bt * TB

    # Fold 1/sqrt(head_dim) into the Q columns of wqkv / bqkv (one-time prep).
    scale = 1.0 / math.sqrt(D // num_heads)
    wqkv = params["wqkv"].at[:, :, :D].multiply(scale).astype(matmul_dtype)
    bqkv = params["bqkv"].at[:, :, :D].multiply(scale)

    # bf16 matmul operands (MXU throughput, half the weight DMA); biases and
    # LayerNorm params stay f32 because they are added/applied in f32.
    x_mm = x.astype(matmul_dtype)
    if B_pad != B:
        x_mm = jnp.pad(x_mm, ((0, B_pad - B), (0, 0), (0, 0)))
    w_in = params["w_in"].astype(matmul_dtype)
    wo = params["wo"].astype(matmul_dtype)
    w1 = params["w1"].astype(matmul_dtype)
    w2 = params["w2"].astype(matmul_dtype)
    w_out = params["w_out"]
    b_out = params["b_out"]
    if O_pad != O:
        w_out = jnp.pad(w_out, ((0, 0), (0, O_pad - O)))
        b_out = jnp.pad(b_out, ((0, 0), (0, O_pad - O)))
    w_out = w_out.astype(matmul_dtype)

    operands = (x_mm,
                w_in, params["b_in"],
                wqkv, bqkv, wo, params["bo"],
                w1, params["b1"], w2, params["b2"],
                params["ln1_g"], params["ln1_b"],
                params["ln2_g"], params["ln2_b"],
                params["ln3_g"], params["ln3_b"],
                w_out, b_out)

    def layer_spec(arr):                     # stacked (L, a, b) -> block (a, b)
        return pl.BlockSpec((None,) + arr.shape[1:], lambda bt, l: (l, 0, 0))

    def const_spec(arr):                     # whole array, fetched once
        return pl.BlockSpec(arr.shape, lambda bt, l: (0, 0))

    in_specs = [
        pl.BlockSpec((TB, S, H), lambda bt, l: (bt, 0, 0)),   # x tile
        const_spec(w_in), const_spec(params["b_in"]),
        layer_spec(wqkv), layer_spec(bqkv),
        layer_spec(wo), layer_spec(params["bo"]),
        layer_spec(w1), layer_spec(params["b1"]),
        layer_spec(w2), layer_spec(params["b2"]),
        layer_spec(params["ln1_g"]), layer_spec(params["ln1_b"]),
        layer_spec(params["ln2_g"]), layer_spec(params["ln2_b"]),
        layer_spec(params["ln3_g"]), layer_spec(params["ln3_b"]),
        const_spec(w_out), const_spec(b_out),
    ]
    out_specs = pl.BlockSpec((TB, S, O_pad), lambda bt, l: (bt, 0, 0))

    # Advisory cost estimate for XLA scheduling around the fused call.
    M = TB * S
    flops_layer = (2 * M * D * 3 * D            # QKV projection
                   + 4 * TB * S * S * D          # scores + context
                   + 2 * M * D * D               # per-head W_O accumulation
                   + 4 * M * D * F)              # feed-forward
    flops = n_bt * (2 * M * H * D + L * flops_layer + 2 * M * D * O_pad)
    transcendentals = n_bt * L * num_heads * TB * (S * S + S)
    layer_bytes = ((3 * D * D + D * D + D * F + F * D) * mm_bytes
                   + (3 * D + 2 * D + F + 6 * D) * 4)
    const_bytes = (H * D + D * O_pad) * mm_bytes + (D + O_pad) * 4
    bytes_accessed = (n_bt * L * layer_bytes + const_bytes
                      + B_pad * S * H * mm_bytes + B_pad * S * O_pad * 4)

    # TODO(synk): with a single batch tile (small B), one v7x TensorCore idles;
    # sharding the head loop / batch tile via core_map would recover it.
    out = pl.pallas_call(
        functools.partial(_fused_forward_kernel, num_heads=num_heads),
        out_shape=jax.ShapeDtypeStruct((B_pad, S, O_pad), x.dtype),
        grid_spec=pltpu.PrefetchScalarGridSpec(
            num_scalar_prefetch=0,
            grid=(n_bt, L),
            in_specs=in_specs,
            out_specs=out_specs,
            scratch_shapes=[pltpu.VMEM((M, D), jnp.float32)],   # resident act.
        ),
        compiler_params=pltpu.CompilerParams(
            dimension_semantics=("parallel", "arbitrary"),
            vmem_limit_bytes=vmem_limit),
        cost_estimate=pl.CostEstimate(flops=int(flops),
                                      transcendentals=int(transcendentals),
                                      bytes_accessed=int(bytes_accessed)),
    )(*operands)

    if B_pad != B:
        out = out[:B]
    return out[..., :O] if O_pad != O else out


if __name__ == "__main__":
    B, S = 2, 8
    hidden_size = 32
    d_model = 64
    num_heads = 4
    ff_dim = 128
    num_layers = 2
    output_dim = 16

    key = jax.random.PRNGKey(0)
    kx, kp = jax.random.split(key)
    x = jax.random.normal(kx, (B, S, hidden_size), jnp.float32)
    params = init_params(kp, hidden_size, d_model, ff_dim, num_layers,
                         output_dim)

    out = transformer_ensembler(x, params, num_heads)
    out = jax.block_until_ready(out)
    assert out.shape == (B, S, output_dim)
    assert bool(jnp.all(jnp.isfinite(out)))
    print("KERNEL_OK")
</pallas_src>

<mosaic_0001>
module attributes {stable_mosaic.version = 11 : i64} {
  func.func @_fused_forward_kernel(%arg0: i32, %arg1: i32, %arg2: memref<2x8x32xbf16, #tpu.memory_space<vmem>>, %arg3: memref<32x64xbf16, #tpu.memory_space<vmem>>, %arg4: memref<1x64xf32, #tpu.memory_space<vmem>>, %arg5: memref<1x64x192xbf16, #tpu.memory_space<vmem>>, %arg6: memref<1x1x192xf32, #tpu.memory_space<vmem>>, %arg7: memref<1x64x64xbf16, #tpu.memory_space<vmem>>, %arg8: memref<1x1x64xf32, #tpu.memory_space<vmem>>, %arg9: memref<1x64x128xbf16, #tpu.memory_space<vmem>>, %arg10: memref<1x1x128xf32, #tpu.memory_space<vmem>>, %arg11: memref<1x128x64xbf16, #tpu.memory_space<vmem>>, %arg12: memref<1x1x64xf32, #tpu.memory_space<vmem>>, %arg13: memref<1x1x64xf32, #tpu.memory_space<vmem>>, %arg14: memref<1x1x64xf32, #tpu.memory_space<vmem>>, %arg15: memref<1x1x64xf32, #tpu.memory_space<vmem>>, %arg16: memref<1x1x64xf32, #tpu.memory_space<vmem>>, %arg17: memref<1x1x64xf32, #tpu.memory_space<vmem>>, %arg18: memref<1x1x64xf32, #tpu.memory_space<vmem>>, %arg19: memref<64x128xbf16, #tpu.memory_space<vmem>>, %arg20: memref<1x128xf32, #tpu.memory_space<vmem>>, %arg21: memref<2x8x128xf32, #tpu.memory_space<vmem>>, %arg22: memref<16x64xf32, #tpu.memory_space<vmem>>) attributes {dimension_semantics = [#tpu.dimension_semantics<parallel>, #tpu.dimension_semantics<arbitrary>], iteration_bounds = array<i64: 1, 2>, scalar_prefetch = 0 : i64, scratch_operands = 1 : i64, tpu.core_type = #tpu.core_type<tc>, window_params = [{transform_indices = @transform_0, window_bounds = array<i64: 2, 8, 32>}, {pipeline_mode = #tpu.pipeline_mode<synchronous>, transform_indices = @transform_1, window_bounds = array<i64: 32, 64>}, {pipeline_mode = #tpu.pipeline_mode<synchronous>, transform_indices = @transform_2, window_bounds = array<i64: 1, 64>}, {transform_indices = @transform_3, window_bounds = array<i64: 1, 64, 192>}, {transform_indices = @transform_4, window_bounds = array<i64: 1, 1, 192>}, {transform_indices = @transform_5, window_bounds = array<i64: 1, 64, 64>}, {transform_indices = @transform_6, window_bounds = array<i64: 1, 1, 64>}, {transform_indices = @transform_7, window_bounds = array<i64: 1, 64, 128>}, {transform_indices = @transform_8, window_bounds = array<i64: 1, 1, 128>}, {transform_indices = @transform_9, window_bounds = array<i64: 1, 128, 64>}, {transform_indices = @transform_10, window_bounds = array<i64: 1, 1, 64>}, {transform_indices = @transform_11, window_bounds = array<i64: 1, 1, 64>}, {transform_indices = @transform_12, window_bounds = array<i64: 1, 1, 64>}, {transform_indices = @transform_13, window_bounds = array<i64: 1, 1, 64>}, {transform_indices = @transform_14, window_bounds = array<i64: 1, 1, 64>}, {transform_indices = @transform_15, window_bounds = array<i64: 1, 1, 64>}, {transform_indices = @transform_16, window_bounds = array<i64: 1, 1, 64>}, {pipeline_mode = #tpu.pipeline_mode<synchronous>, transform_indices = @transform_17, window_bounds = array<i64: 64, 128>}, {pipeline_mode = #tpu.pipeline_mode<synchronous>, transform_indices = @transform_18, window_bounds = array<i64: 1, 128>}, {transform_indices = @transform_19, window_bounds = array<i64: 2, 8, 128>}]} {
    %c0_i32 = arith.constant 0 : i32
    %0 = arith.cmpi eq, %arg1, %c0_i32 : i32
    %1 = arith.extui %0 : i1 to i32
    %c0_i32_0 = arith.constant 0 : i32
    %2 = arith.cmpi ne, %1, %c0_i32_0 : i32
    scf.if %2 {
      %c0_91 = arith.constant 0 : index
      %c0_92 = arith.constant 0 : index
      %c0_93 = arith.constant 0 : index
      %230 = vector.load %arg2[%c0_91, %c0_92, %c0_93] : memref<2x8x32xbf16, #tpu.memory_space<vmem>>, vector<2x8x32xbf16>
      %231 = vector.shape_cast %230 : vector<2x8x32xbf16> to vector<16x32xbf16>
      %c0_94 = arith.constant 0 : index
      %c0_95 = arith.constant 0 : index
      %232 = vector.load %arg3[%c0_94, %c0_95] : memref<32x64xbf16, #tpu.memory_space<vmem>>, vector<32x64xbf16>
      %cst_96 = arith.constant dense<0.000000e+00> : vector<16x64xf32>
      %233 = tpu.matmul %231, %232, %cst_96 {dimension_numbers = #tpu.dot_dimension_numbers<[1], [0], [0], [1], [0, 0, 1, 1], [], []>} : vector<16x32xbf16>, vector<32x64xbf16>, vector<16x64xf32> -> vector<16x64xf32>
      %c0_97 = arith.constant 0 : index
      %c0_98 = arith.constant 0 : index
      %234 = vector.load %arg4[%c0_97, %c0_98] : memref<1x64xf32, #tpu.memory_space<vmem>>, vector<1x64xf32>
      %235 = vector.broadcast %234 : vector<1x64xf32> to vector<16x64xf32>
      %236 = arith.addf %233, %235 : vector<16x64xf32>
      %cst_99 = arith.constant 0.000000e+00 : f32
      %237 = vector.broadcast %cst_99 : f32 to vector<16x64xf32>
      %238 = arith.maximumf %236, %237 : vector<16x64xf32>
      %c0_100 = arith.constant 0 : index
      %c0_101 = arith.constant 0 : index
      %239 = vector.load %arg22[%c0_100, %c0_101] : memref<16x64xf32, #tpu.memory_space<vmem>>, vector<16x64xf32>
      tpu.vector_store %arg22[%c0_100, %c0_101], %238 {strides = array<i32>} : memref<16x64xf32, #tpu.memory_space<vmem>>, vector<16x64xf32>,
    } else {
    }
    %c0 = arith.constant 0 : index
    %c0_1 = arith.constant 0 : index
    %3 = vector.load %arg22[%c0, %c0_1] : memref<16x64xf32, #tpu.memory_space<vmem>>, vector<16x64xf32>
    %4 = arith.truncf %3 : vector<16x64xf32> to vector<16x64xbf16>
    %c0_2 = arith.constant 0 : index
    %c0_3 = arith.constant 0 : index
    %c0_4 = arith.constant 0 : index
    %5 = vector.load %arg5[%c0_2, %c0_3, %c0_4] : memref<1x64x192xbf16, #tpu.memory_space<vmem>>, vector<1x64x192xbf16>
    %6 = vector.shape_cast %5 : vector<1x64x192xbf16> to vector<64x192xbf16>
    %cst = arith.constant dense<0.000000e+00> : vector<16x192xf32>
    %7 = tpu.matmul %4, %6, %cst {dimension_numbers = #tpu.dot_dimension_numbers<[1], [0], [0], [1], [0, 0, 1, 1], [], []>} : vector<16x64xbf16>, vector<64x192xbf16>, vector<16x192xf32> -> vector<16x192xf32>
    %c0_5 = arith.constant 0 : index
    %c0_6 = arith.constant 0 : index
    %c0_7 = arith.constant 0 : index
    %8 = vector.load %arg6[%c0_5, %c0_6, %c0_7] : memref<1x1x192xf32, #tpu.memory_space<vmem>>, vector<1x1x192xf32>
    %9 = vector.shape_cast %8 : vector<1x1x192xf32> to vector<1x192xf32>
    %10 = vector.broadcast %9 : vector<1x192xf32> to vector<16x192xf32>
    %11 = arith.addf %7, %10 : vector<16x192xf32>
    %c0_8 = arith.constant 0 : index
    %c0_9 = arith.constant 0 : index
    %c0_10 = arith.constant 0 : index
    %12 = vector.load %arg8[%c0_8, %c0_9, %c0_10] : memref<1x1x64xf32, #tpu.memory_space<vmem>>, vector<1x1x64xf32>
    %13 = vector.shape_cast %12 : vector<1x1x64xf32> to vector<1x64xf32>
    %14 = vector.shape_cast %13 : vector<1x64xf32> to vector<1x64xf32>
    %15 = vector.broadcast %14 : vector<1x64xf32> to vector<16x64xf32>
    %16 = vector.extract_strided_slice %11 {offsets = [0, 0], sizes = [16, 16], strides = [1, 1]} : vector<16x192xf32> to vector<16x16xf32>
    %17 = arith.truncf %16 : vector<16x16xf32> to vector<16x16xbf16>
    %18 = vector.shape_cast %17 : vector<16x16xbf16> to vector<2x8x16xbf16>
    %19 = vector.extract_strided_slice %11 {offsets = [0, 64], sizes = [16, 16], strides = [1, 1]} : vector<16x192xf32> to vector<16x16xf32>
    %20 = arith.truncf %19 : vector<16x16xf32> to vector<16x16xbf16>
    %21 = vector.shape_cast %20 : vector<16x16xbf16> to vector<2x8x16xbf16>
    %22 = vector.extract_strided_slice %11 {offsets = [0, 128], sizes = [16, 16], strides = [1, 1]} : vector<16x192xf32> to vector<16x16xf32>
    %23 = arith.truncf %22 : vector<16x16xf32> to vector<16x16xbf16>
    %24 = vector.shape_cast %23 : vector<16x16xbf16> to vector<2x8x16xbf16>
    "tpu.trace_start"() <{level = 10 : i32, message = "bqd,bkd->bqk"}> : () -> ()
    %cst_11 = arith.constant dense<0.000000e+00> : vector<2x8x8xf32>
    %25 = tpu.matmul %18, %21, %cst_11 {dimension_numbers = #tpu.dot_dimension_numbers<[2], [2], [1], [1], [0, 0, 0, 1, 1, 1], [0], [0]>} : vector<2x8x16xbf16>, vector<2x8x16xbf16>, vector<2x8x8xf32> -> vector<2x8x8xf32>
    "tpu.trace_stop"() : () -> ()
    %cst_12 = arith.constant dense<0xFF800000> : vector<2x8xf32>
    %26 = vector.multi_reduction <maximumf>, %25, %cst_12 [2] : vector<2x8x8xf32> to vector<2x8xf32>
    %27 = vector.shape_cast %26 : vector<2x8xf32> to vector<2x8x1xf32>
    %28 = vector.broadcast %27 : vector<2x8x1xf32> to vector<2x8x8xf32>
    %29 = arith.subf %25, %28 : vector<2x8x8xf32>
    %30 = math.exp %29 : vector<2x8x8xf32>
    %cst_13 = arith.constant dense<0.000000e+00> : vector<2x8xf32>
    %31 = vector.multi_reduction <add>, %30, %cst_13 [2] : vector<2x8x8xf32> to vector<2x8xf32>
    %32 = vector.shape_cast %31 : vector<2x8xf32> to vector<2x8x1xf32>
    %33 = tpu.reciprocal %32 {approx = true} : vector<2x8x1xf32> -> vector<2x8x1xf32>
    %34 = vector.broadcast %33 : vector<2x8x1xf32> to vector<2x8x8xf32>
    %35 = arith.mulf %30, %34 : vector<2x8x8xf32>
    %36 = arith.truncf %35 : vector<2x8x8xf32> to vector<2x8x8xbf16>
    "tpu.trace_start"() <{level = 10 : i32, message = "bqk,bkd->bqd"}> : () -> ()
    %cst_14 = arith.constant dense<0.000000e+00> : vector<2x8x16xf32>
    %37 = tpu.matmul %36, %24, %cst_14 {dimension_numbers = #tpu.dot_dimension_numbers<[2], [1], [1], [2], [0, 0, 0, 1, 1, 2], [0], [0]>} : vector<2x8x8xbf16>, vector<2x8x16xbf16>, vector<2x8x16xf32> -> vector<2x8x16xf32>
    "tpu.trace_stop"() : () -> ()
    %38 = vector.shape_cast %37 : vector<2x8x16xf32> to vector<16x16xf32>
    %39 = arith.truncf %38 : vector<16x16xf32> to vector<16x16xbf16>
    %c0_15 = arith.constant 0 : index
    %c0_16 = arith.constant 0 : index
    %c0_17 = arith.constant 0 : index
    %40 = vector.load %arg7[%c0_15, %c0_16, %c0_17] : memref<1x64x64xbf16, #tpu.memory_space<vmem>>, vector<1x16x64xbf16>
    %41 = vector.shape_cast %40 : vector<1x16x64xbf16> to vector<16x64xbf16>
    %cst_18 = arith.constant dense<0.000000e+00> : vector<16x64xf32>
    %42 = tpu.matmul %39, %41, %cst_18 {dimension_numbers = #tpu.dot_dimension_numbers<[1], [0], [0], [1], [0, 0, 1, 1], [], []>} : vector<16x16xbf16>, vector<16x64xbf16>, vector<16x64xf32> -> vector<16x64xf32>
    %43 = arith.addf %15, %42 : vector<16x64xf32>
    %44 = vector.extract_strided_slice %11 {offsets = [0, 16], sizes = [16, 16], strides = [1, 1]} : vector<16x192xf32> to vector<16x16xf32>
    %45 = arith.truncf %44 : vector<16x16xf32> to vector<16x16xbf16>
    %46 = vector.shape_cast %45 : vector<16x16xbf16> to vector<2x8x16xbf16>
    %47 = vector.extract_strided_slice %11 {offsets = [0, 80], sizes = [16, 16], strides = [1, 1]} : vector<16x192xf32> to vector<16x16xf32>
    %48 = arith.truncf %47 : vector<16x16xf32> to vector<16x16xbf16>
    %49 = vector.shape_cast %48 : vector<16x16xbf16> to vector<2x8x16xbf16>
    %50 = vector.extract_strided_slice %11 {offsets = [0, 144], sizes = [16, 16], strides = [1, 1]} : vector<16x192xf32> to vector<16x16xf32>
    %51 = arith.truncf %50 : vector<16x16xf32> to vector<16x16xbf16>
    %52 = vector.shape_cast %51 : vector<16x16xbf16> to vector<2x8x16xbf16>
    "tpu.trace_start"() <{level = 10 : i32, message = "bqd,bkd->bqk"}> : () -> ()
    %cst_19 = arith.constant dense<0.000000e+00> : vector<2x8x8xf32>
    %53 = tpu.matmul %46, %49, %cst_19 {dimension_numbers = #tpu.dot_dimension_numbers<[2], [2], [1], [1], [0, 0, 0, 1, 1, 1], [0], [0]>} : vector<2x8x16xbf16>, vector<2x8x16xbf16>, vector<2x8x8xf32> -> vector<2x8x8xf32>
    "tpu.trace_stop"() : () -> ()
    %cst_20 = arith.constant dense<0xFF800000> : vector<2x8xf32>
    %54 = vector.multi_reduction <maximumf>, %53, %cst_20 [2] : vector<2x8x8xf32> to vector<2x8xf32>
    %55 = vector.shape_cast %54 : vector<2x8xf32> to vector<2x8x1xf32>
    %56 = vector.broadcast %55 : vector<2x8x1xf32> to vector<2x8x8xf32>
    %57 = arith.subf %53, %56 : vector<2x8x8xf32>
    %58 = math.exp %57 : vector<2x8x8xf32>
    %cst_21 = arith.constant dense<0.000000e+00> : vector<2x8xf32>
    %59 = vector.multi_reduction <add>, %58, %cst_21 [2] : vector<2x8x8xf32> to vector<2x8xf32>
    %60 = vector.shape_cast %59 : vector<2x8xf32> to vector<2x8x1xf32>
    %61 = tpu.reciprocal %60 {approx = true} : vector<2x8x1xf32> -> vector<2x8x1xf32>
    %62 = vector.broadcast %61 : vector<2x8x1xf32> to vector<2x8x8xf32>
    %63 = arith.mulf %58, %62 : vector<2x8x8xf32>
    %64 = arith.truncf %63 : vector<2x8x8xf32> to vector<2x8x8xbf16>
    "tpu.trace_start"() <{level = 10 : i32, message = "bqk,bkd->bqd"}> : () -> ()
    %cst_22 = arith.constant dense<0.000000e+00> : vector<2x8x16xf32>
    %65 = tpu.matmul %64, %52, %cst_22 {dimension_numbers = #tpu.dot_dimension_numbers<[2], [1], [1], [2], [0, 0, 0, 1, 1, 2], [0], [0]>} : vector<2x8x8xbf16>, vector<2x8x16xbf16>, vector<2x8x16xf32> -> vector<2x8x16xf32>
    "tpu.trace_stop"() : () -> ()
    %66 = vector.shape_cast %65 : vector<2x8x16xf32> to vector<16x16xf32>
    %67 = arith.truncf %66 : vector<16x16xf32> to vector<16x16xbf16>
    %c0_23 = arith.constant 0 : index
    %c16 = arith.constant 16 : index
    %c0_24 = arith.constant 0 : index
    %68 = vector.load %arg7[%c0_23, %c16, %c0_24] : memref<1x64x64xbf16, #tpu.memory_space<vmem>>, vector<1x16x64xbf16>
    %69 = vector.shape_cast %68 : vector<1x16x64xbf16> to vector<16x64xbf16>
    %cst_25 = arith.constant dense<0.000000e+00> : vector<16x64xf32>
    %70 = tpu.matmul %67, %69, %cst_25 {dimension_numbers = #tpu.dot_dimension_numbers<[1], [0], [0], [1], [0, 0, 1, 1], [], []>} : vector<16x16xbf16>, vector<16x64xbf16>, vector<16x64xf32> -> vector<16x64xf32>
    %71 = arith.addf %43, %70 : vector<16x64xf32>
    %72 = vector.extract_strided_slice %11 {offsets = [0, 32], sizes = [16, 16], strides = [1, 1]} : vector<16x192xf32> to vector<16x16xf32>
    %73 = arith.truncf %72 : vector<16x16xf32> to vector<16x16xbf16>
    %74 = vector.shape_cast %73 : vector<16x16xbf16> to vector<2x8x16xbf16>
    %75 = vector.extract_strided_slice %11 {offsets = [0, 96], sizes = [16, 16], strides = [1, 1]} : vector<16x192xf32> to vector<16x16xf32>
    %76 = arith.truncf %75 : vector<16x16xf32> to vector<16x16xbf16>
    %77 = vector.shape_cast %76 : vector<16x16xbf16> to vector<2x8x16xbf16>
    %78 = vector.extract_strided_slice %11 {offsets = [0, 160], sizes = [16, 16], strides = [1, 1]} : vector<16x192xf32> to vector<16x16xf32>
    %79 = arith.truncf %78 : vector<16x16xf32> to vector<16x16xbf16>
    %80 = vector.shape_cast %79 : vector<16x16xbf16> to vector<2x8x16xbf16>
    "tpu.trace_start"() <{level = 10 : i32, message = "bqd,bkd->bqk"}> : () -> ()
    %cst_26 = arith.constant dense<0.000000e+00> : vector<2x8x8xf32>
    %81 = tpu.matmul %74, %77, %cst_26 {dimension_numbers = #tpu.dot_dimension_numbers<[2], [2], [1], [1], [0, 0, 0, 1, 1, 1], [0], [0]>} : vector<2x8x16xbf16>, vector<2x8x16xbf16>, vector<2x8x8xf32> -> vector<2x8x8xf32>
    "tpu.trace_stop"() : () -> ()
    %cst_27 = arith.constant dense<0xFF800000> : vector<2x8xf32>
    %82 = vector.multi_reduction <maximumf>, %81, %cst_27 [2] : vector<2x8x8xf32> to vector<2x8xf32>
    %83 = vector.shape_cast %82 : vector<2x8xf32> to vector<2x8x1xf32>
    %84 = vector.broadcast %83 : vector<2x8x1xf32> to vector<2x8x8xf32>
    %85 = arith.subf %81, %84 : vector<2x8x8xf32>
    %86 = math.exp %85 : vector<2x8x8xf32>
    %cst_28 = arith.constant dense<0.000000e+00> : vector<2x8xf32>
    %87 = vector.multi_reduction <add>, %86, %cst_28 [2] : vector<2x8x8xf32> to vector<2x8xf32>
    %88 = vector.shape_cast %87 : vector<2x8xf32> to vector<2x8x1xf32>
    %89 = tpu.reciprocal %88 {approx = true} : vector<2x8x1xf32> -> vector<2x8x1xf32>
    %90 = vector.broadcast %89 : vector<2x8x1xf32> to vector<2x8x8xf32>
    %91 = arith.mulf %86, %90 : vector<2x8x8xf32>
    %92 = arith.truncf %91 : vector<2x8x8xf32> to vector<2x8x8xbf16>
    "tpu.trace_start"() <{level = 10 : i32, message = "bqk,bkd->bqd"}> : () -> ()
    %cst_29 = arith.constant dense<0.000000e+00> : vector<2x8x16xf32>
    %93 = tpu.matmul %92, %80, %cst_29 {dimension_numbers = #tpu.dot_dimension_numbers<[2], [1], [1], [2], [0, 0, 0, 1, 1, 2], [0], [0]>} : vector<2x8x8xbf16>, vector<2x8x16xbf16>, vector<2x8x16xf32> -> vector<2x8x16xf32>
    "tpu.trace_stop"() : () -> ()
    %94 = vector.shape_cast %93 : vector<2x8x16xf32> to vector<16x16xf32>
    %95 = arith.truncf %94 : vector<16x16xf32> to vector<16x16xbf16>
    %c0_30 = arith.constant 0 : index
    %c32 = arith.constant 32 : index
    %c0_31 = arith.constant 0 : index
    %96 = vector.load %arg7[%c0_30, %c32, %c0_31] : memref<1x64x64xbf16, #tpu.memory_space<vmem>>, vector<1x16x64xbf16>
    %97 = vector.shape_cast %96 : vector<1x16x64xbf16> to vector<16x64xbf16>
    %cst_32 = arith.constant dense<0.000000e+00> : vector<16x64xf32>
    %98 = tpu.matmul %95, %97, %cst_32 {dimension_numbers = #tpu.dot_dimension_numbers<[1], [0], [0], [1], [0, 0, 1, 1], [], []>} : vector<16x16xbf16>, vector<16x64xbf16>, vector<16x64xf32> -> vector<16x64xf32>
    %99 = arith.addf %71, %98 : vector<16x64xf32>
    %100 = vector.extract_strided_slice %11 {offsets = [0, 48], sizes = [16, 16], strides = [1, 1]} : vector<16x192xf32> to vector<16x16xf32>
    %101 = arith.truncf %100 : vector<16x16xf32> to vector<16x16xbf16>
    %102 = vector.shape_cast %101 : vector<16x16xbf16> to vector<2x8x16xbf16>
    %103 = vector.extract_strided_slice %11 {offsets = [0, 112], sizes = [16, 16], strides = [1, 1]} : vector<16x192xf32> to vector<16x16xf32>
    %104 = arith.truncf %103 : vector<16x16xf32> to vector<16x16xbf16>
    %105 = vector.shape_cast %104 : vector<16x16xbf16> to vector<2x8x16xbf16>
    %106 = vector.extract_strided_slice %11 {offsets = [0, 176], sizes = [16, 16], strides = [1, 1]} : vector<16x192xf32> to vector<16x16xf32>
    %107 = arith.truncf %106 : vector<16x16xf32> to vector<16x16xbf16>
    %108 = vector.shape_cast %107 : vector<16x16xbf16> to vector<2x8x16xbf16>
    "tpu.trace_start"() <{level = 10 : i32, message = "bqd,bkd->bqk"}> : () -> ()
    %cst_33 = arith.constant dense<0.000000e+00> : vector<2x8x8xf32>
    %109 = tpu.matmul %102, %105, %cst_33 {dimension_numbers = #tpu.dot_dimension_numbers<[2], [2], [1], [1], [0, 0, 0, 1, 1, 1], [0], [0]>} : vector<2x8x16xbf16>, vector<2x8x16xbf16>, vector<2x8x8xf32> -> vector<2x8x8xf32>
    "tpu.trace_stop"() : () -> ()
    %cst_34 = arith.constant dense<0xFF800000> : vector<2x8xf32>
    %110 = vector.multi_reduction <maximumf>, %109, %cst_34 [2] : vector<2x8x8xf32> to vector<2x8xf32>
    %111 = vector.shape_cast %110 : vector<2x8xf32> to vector<2x8x1xf32>
    %112 = vector.broadcast %111 : vector<2x8x1xf32> to vector<2x8x8xf32>
    %113 = arith.subf %109, %112 : vector<2x8x8xf32>
    %114 = math.exp %113 : vector<2x8x8xf32>
    %cst_35 = arith.constant dense<0.000000e+00> : vector<2x8xf32>
    %115 = vector.multi_reduction <add>, %114, %cst_35 [2] : vector<2x8x8xf32> to vector<2x8xf32>
    %116 = vector.shape_cast %115 : vector<2x8xf32> to vector<2x8x1xf32>
    %117 = tpu.reciprocal %116 {approx = true} : vector<2x8x1xf32> -> vector<2x8x1xf32>
    %118 = vector.broadcast %117 : vector<2x8x1xf32> to vector<2x8x8xf32>
    %119 = arith.mulf %114, %118 : vector<2x8x8xf32>
    %120 = arith.truncf %119 : vector<2x8x8xf32> to vector<2x8x8xbf16>
    "tpu.trace_start"() <{level = 10 : i32, message = "bqk,bkd->bqd"}> : () -> ()
    %cst_36 = arith.constant dense<0.000000e+00> : vector<2x8x16xf32>
    %121 = tpu.matmul %120, %108, %cst_36 {dimension_numbers = #tpu.dot_dimension_numbers<[2], [1], [1], [2], [0, 0, 0, 1, 1, 2], [0], [0]>} : vector<2x8x8xbf16>, vector<2x8x16xbf16>, vector<2x8x16xf32> -> vector<2x8x16xf32>
    "tpu.trace_stop"() : () -> ()
    %122 = vector.shape_cast %121 : vector<2x8x16xf32> to vector<16x16xf32>
    %123 = arith.truncf %122 : vector<16x16xf32> to vector<16x16xbf16>
    %c0_37 = arith.constant 0 : index
    %c48 = arith.constant 48 : index
    %c0_38 = arith.constant 0 : index
    %124 = vector.load %arg7[%c0_37, %c48, %c0_38] : memref<1x64x64xbf16, #tpu.memory_space<vmem>>, vector<1x16x64xbf16>
    %125 = vector.shape_cast %124 : vector<1x16x64xbf16> to vector<16x64xbf16>
    %cst_39 = arith.constant dense<0.000000e+00> : vector<16x64xf32>
    %126 = tpu.matmul %123, %125, %cst_39 {dimension_numbers = #tpu.dot_dimension_numbers<[1], [0], [0], [1], [0, 0, 1, 1], [], []>} : vector<16x16xbf16>, vector<16x64xbf16>, vector<16x64xf32> -> vector<16x64xf32>
    %127 = arith.addf %99, %126 : vector<16x64xf32>
    %128 = arith.addf %3, %127 : vector<16x64xf32>
    %c0_40 = arith.constant 0 : index
    %c0_41 = arith.constant 0 : index
    %c0_42 = arith.constant 0 : index
    %129 = vector.load %arg13[%c0_40, %c0_41, %c0_42] : memref<1x1x64xf32, #tpu.memory_space<vmem>>, vector<1x1x64xf32>
    %130 = vector.shape_cast %129 : vector<1x1x64xf32> to vector<1x64xf32>
    %c0_43 = arith.constant 0 : index
    %c0_44 = arith.constant 0 : index
    %c0_45 = arith.constant 0 : index
    %131 = vector.load %arg14[%c0_43, %c0_44, %c0_45] : memref<1x1x64xf32, #tpu.memory_space<vmem>>, vector<1x1x64xf32>
    %132 = vector.shape_cast %131 : vector<1x1x64xf32> to vector<1x64xf32>
    %cst_46 = arith.constant dense<0.000000e+00> : vector<16xf32>
    %133 = vector.multi_reduction <add>, %128, %cst_46 [1] : vector<16x64xf32> to vector<16xf32>
    %134 = vector.shape_cast %133 : vector<16xf32> to vector<16x1xf32>
    %cst_47 = arith.constant 6.400000e+01 : f32
    %135 = vector.broadcast %cst_47 : f32 to vector<16x1xf32>
    %136 = arith.divf %134, %135 : vector<16x1xf32>
    %137 = vector.broadcast %136 : vector<16x1xf32> to vector<16x64xf32>
    %138 = arith.subf %128, %137 : vector<16x64xf32>
    %139 = arith.mulf %138, %138 : vector<16x64xf32>
    %cst_48 = arith.constant dense<0.000000e+00> : vector<16xf32>
    %140 = vector.multi_reduction <add>, %139, %cst_48 [1] : vector<16x64xf32> to vector<16xf32>
    %141 = vector.shape_cast %140 : vector<16xf32> to vector<16x1xf32>
    %cst_49 = arith.constant 6.400000e+01 : f32
    %142 = vector.broadcast %cst_49 : f32 to vector<16x1xf32>
    %143 = arith.divf %141, %142 : vector<16x1xf32>
    %144 = vector.broadcast %136 : vector<16x1xf32> to vector<16x64xf32>
    %145 = arith.subf %128, %144 : vector<16x64xf32>
    %cst_50 = arith.constant 9.99999974E-6 : f32
    %146 = vector.broadcast %cst_50 : f32 to vector<16x1xf32>
    %147 = arith.addf %143, %146 : vector<16x1xf32>
    %148 = math.rsqrt %147 : vector<16x1xf32>
    %149 = vector.broadcast %148 : vector<16x1xf32> to vector<16x64xf32>
    %150 = arith.mulf %145, %149 : vector<16x64xf32>
    %151 = vector.broadcast %130 : vector<1x64xf32> to vector<16x64xf32>
    %152 = arith.mulf %150, %151 : vector<16x64xf32>
    %153 = vector.broadcast %132 : vector<1x64xf32> to vector<16x64xf32>
    %154 = arith.addf %152, %153 : vector<16x64xf32>
    %155 = arith.truncf %154 : vector<16x64xf32> to vector<16x64xbf16>
    %c0_51 = arith.constant 0 : index
    %c0_52 = arith.constant 0 : index
    %c0_53 = arith.constant 0 : index
    %156 = vector.load %arg9[%c0_51, %c0_52, %c0_53] : memref<1x64x128xbf16, #tpu.memory_space<vmem>>, vector<1x64x128xbf16>
    %157 = vector.shape_cast %156 : vector<1x64x128xbf16> to vector<64x128xbf16>
    %cst_54 = arith.constant dense<0.000000e+00> : vector<16x128xf32>
    %158 = tpu.matmul %155, %157, %cst_54 {dimension_numbers = #tpu.dot_dimension_numbers<[1], [0], [0], [1], [0, 0, 1, 1], [], []>} : vector<16x64xbf16>, vector<64x128xbf16>, vector<16x128xf32> -> vector<16x128xf32>
    %c0_55 = arith.constant 0 : index
    %c0_56 = arith.constant 0 : index
    %c0_57 = arith.constant 0 : index
    %159 = vector.load %arg10[%c0_55, %c0_56, %c0_57] : memref<1x1x128xf32, #tpu.memory_space<vmem>>, vector<1x1x128xf32>
    %160 = vector.shape_cast %159 : vector<1x1x128xf32> to vector<1x128xf32>
    %161 = vector.broadcast %160 : vector<1x128xf32> to vector<16x128xf32>
    %162 = arith.addf %158, %161 : vector<16x128xf32>
    %cst_58 = arith.constant 0.000000e+00 : f32
    %163 = vector.broadcast %cst_58 : f32 to vector<16x128xf32>
    %164 = arith.maximumf %162, %163 : vector<16x128xf32>
    %165 = arith.truncf %164 : vector<16x128xf32> to vector<16x128xbf16>
    %c0_59 = arith.constant 0 : index
    %c0_60 = arith.constant 0 : index
    %c0_61 = arith.constant 0 : index
    %166 = vector.load %arg11[%c0_59, %c0_60, %c0_61] : memref<1x128x64xbf16, #tpu.memory_space<vmem>>, vector<1x128x64xbf16>
    %167 = vector.shape_cast %166 : vector<1x128x64xbf16> to vector<128x64xbf16>
    %cst_62 = arith.constant dense<0.000000e+00> : vector<16x64xf32>
    %168 = tpu.matmul %165, %167, %cst_62 {dimension_numbers = #tpu.dot_dimension_numbers<[1], [0], [0], [1], [0, 0, 1, 1], [], []>} : vector<16x128xbf16>, vector<128x64xbf16>, vector<16x64xf32> -> vector<16x64xf32>
    %c0_63 = arith.constant 0 : index
    %c0_64 = arith.constant 0 : index
    %c0_65 = arith.constant 0 : index
    %169 = vector.load %arg12[%c0_63, %c0_64, %c0_65] : memref<1x1x64xf32, #tpu.memory_space<vmem>>, vector<1x1x64xf32>
    %170 = vector.shape_cast %169 : vector<1x1x64xf32> to vector<1x64xf32>
    %171 = vector.broadcast %170 : vector<1x64xf32> to vector<16x64xf32>
    %172 = arith.addf %168, %171 : vector<16x64xf32>
    %173 = arith.addf %154, %172 : vector<16x64xf32>
    %c0_66 = arith.constant 0 : index
    %c0_67 = arith.constant 0 : index
    %c0_68 = arith.constant 0 : index
    %174 = vector.load %arg15[%c0_66, %c0_67, %c0_68] : memref<1x1x64xf32, #tpu.memory_space<vmem>>, vector<1x1x64xf32>
    %175 = vector.shape_cast %174 : vector<1x1x64xf32> to vector<1x64xf32>
    %c0_69 = arith.constant 0 : index
    %c0_70 = arith.constant 0 : index
    %c0_71 = arith.constant 0 : index
    %176 = vector.load %arg16[%c0_69, %c0_70, %c0_71] : memref<1x1x64xf32, #tpu.memory_space<vmem>>, vector<1x1x64xf32>
    %177 = vector.shape_cast %176 : vector<1x1x64xf32> to vector<1x64xf32>
    %cst_72 = arith.constant dense<0.000000e+00> : vector<16xf32>
    %178 = vector.multi_reduction <add>, %173, %cst_72 [1] : vector<16x64xf32> to vector<16xf32>
    %179 = vector.shape_cast %178 : vector<16xf32> to vector<16x1xf32>
    %cst_73 = arith.constant 6.400000e+01 : f32
    %180 = vector.broadcast %cst_73 : f32 to vector<16x1xf32>
    %181 = arith.divf %179, %180 : vector<16x1xf32>
    %182 = vector.broadcast %181 : vector<16x1xf32> to vector<16x64xf32>
    %183 = arith.subf %173, %182 : vector<16x64xf32>
    %184 = arith.mulf %183, %183 : vector<16x64xf32>
    %cst_74 = arith.constant dense<0.000000e+00> : vector<16xf32>
    %185 = vector.multi_reduction <add>, %184, %cst_74 [1] : vector<16x64xf32> to vector<16xf32>
    %186 = vector.shape_cast %185 : vector<16xf32> to vector<16x1xf32>
    %cst_75 = arith.constant 6.400000e+01 : f32
    %187 = vector.broadcast %cst_75 : f32 to vector<16x1xf32>
    %188 = arith.divf %186, %187 : vector<16x1xf32>
    %189 = vector.broadcast %181 : vector<16x1xf32> to vector<16x64xf32>
    %190 = arith.subf %173, %189 : vector<16x64xf32>
    %cst_76 = arith.constant 9.99999974E-6 : f32
    %191 = vector.broadcast %cst_76 : f32 to vector<16x1xf32>
    %192 = arith.addf %188, %191 : vector<16x1xf32>
    %193 = math.rsqrt %192 : vector<16x1xf32>
    %194 = vector.broadcast %193 : vector<16x1xf32> to vector<16x64xf32>
    %195 = arith.mulf %190, %194 : vector<16x64xf32>
    %196 = vector.broadcast %175 : vector<1x64xf32> to vector<16x64xf32>
    %197 = arith.mulf %195, %196 : vector<16x64xf32>
    %198 = vector.broadcast %177 : vector<1x64xf32> to vector<16x64xf32>
    %199 = arith.addf %197, %198 : vector<16x64xf32>
    %c0_77 = arith.constant 0 : index
    %c0_78 = arith.constant 0 : index
    %c0_79 = arith.constant 0 : index
    %200 = vector.load %arg17[%c0_77, %c0_78, %c0_79] : memref<1x1x64xf32, #tpu.memory_space<vmem>>, vector<1x1x64xf32>
    %201 = vector.shape_cast %200 : vector<1x1x64xf32> to vector<1x64xf32>
    %c0_80 = arith.constant 0 : index
    %c0_81 = arith.constant 0 : index
    %c0_82 = arith.constant 0 : index
    %202 = vector.load %arg18[%c0_80, %c0_81, %c0_82] : memref<1x1x64xf32, #tpu.memory_space<vmem>>, vector<1x1x64xf32>
    %203 = vector.shape_cast %202 : vector<1x1x64xf32> to vector<1x64xf32>
    %cst_83 = arith.constant dense<0.000000e+00> : vector<16xf32>
    %204 = vector.multi_reduction <add>, %199, %cst_83 [1] : vector<16x64xf32> to vector<16xf32>
    %205 = vector.shape_cast %204 : vector<16xf32> to vector<16x1xf32>
    %cst_84 = arith.constant 6.400000e+01 : f32
    %206 = vector.broadcast %cst_84 : f32 to vector<16x1xf32>
    %207 = arith.divf %205, %206 : vector<16x1xf32>
    %208 = vector.broadcast %207 : vector<16x1xf32> to vector<16x64xf32>
    %209 = arith.subf %199, %208 : vector<16x64xf32>
    %210 = arith.mulf %209, %209 : vector<16x64xf32>
    %cst_85 = arith.constant dense<0.000000e+00> : vector<16xf32>
    %211 = vector.multi_reduction <add>, %210, %cst_85 [1] : vector<16x64xf32> to vector<16xf32>
    %212 = vector.shape_cast %211 : vector<16xf32> to vector<16x1xf32>
    %cst_86 = arith.constant 6.400000e+01 : f32
    %213 = vector.broadcast %cst_86 : f32 to vector<16x1xf32>
    %214 = arith.divf %212, %213 : vector<16x1xf32>
    %215 = vector.broadcast %207 : vector<16x1xf32> to vector<16x64xf32>
    %216 = arith.subf %199, %215 : vector<16x64xf32>
    %cst_87 = arith.constant 9.99999974E-6 : f32
    %217 = vector.broadcast %cst_87 : f32 to vector<16x1xf32>
    %218 = arith.addf %214, %217 : vector<16x1xf32>
    %219 = math.rsqrt %218 : vector<16x1xf32>
    %220 = vector.broadcast %219 : vector<16x1xf32> to vector<16x64xf32>
    %221 = arith.mulf %216, %220 : vector<16x64xf32>
    %222 = vector.broadcast %201 : vector<1x64xf32> to vector<16x64xf32>
    %223 = arith.mulf %221, %222 : vector<16x64xf32>
    %224 = vector.broadcast %203 : vector<1x64xf32> to vector<16x64xf32>
    %225 = arith.addf %223, %224 : vector<16x64xf32>
    %c0_88 = arith.constant 0 : index
    %c0_89 = arith.constant 0 : index
    %226 = vector.load %arg22[%c0_88, %c0_89] : memref<16x64xf32, #tpu.memory_space<vmem>>, vector<16x64xf32>
    tpu.vector_store %arg22[%c0_88, %c0_89], %225 {strides = array<i32>} : memref<16x64xf32, #tpu.memory_space<vmem>>, vector<16x64xf32>,
    %c1_i32 = arith.constant 1 : i32
    %227 = arith.cmpi eq, %arg1, %c1_i32 : i32
    %228 = arith.extui %227 : i1 to i32
    %c0_i32_90 = arith.constant 0 : i32
    %229 = arith.cmpi ne, %228, %c0_i32_90 : i32
    scf.if %229 {
      %230 = arith.truncf %225 : vector<16x64xf32> to vector<16x64xbf16>
      %c0_91 = arith.constant 0 : index
      %c0_92 = arith.constant 0 : index
      %231 = vector.load %arg19[%c0_91, %c0_92] : memref<64x128xbf16, #tpu.memory_space<vmem>>, vector<64x128xbf16>
      %cst_93 = arith.constant dense<0.000000e+00> : vector<16x128xf32>
      %232 = tpu.matmul %230, %231, %cst_93 {dimension_numbers = #tpu.dot_dimension_numbers<[1], [0], [0], [1], [0, 0, 1, 1], [], []>} : vector<16x64xbf16>, vector<64x128xbf16>, vector<16x128xf32> -> vector<16x128xf32>
      %c0_94 = arith.constant 0 : index
      %c0_95 = arith.constant 0 : index
      %233 = vector.load %arg20[%c0_94, %c0_95] : memref<1x128xf32, #tpu.memory_space<vmem>>, vector<1x128xf32>
      %234 = vector.broadcast %233 : vector<1x128xf32> to vector<16x128xf32>
      %235 = arith.addf %232, %234 : vector<16x128xf32>
      %236 = vector.shape_cast %235 : vector<16x128xf32> to vector<2x8x128xf32>
      %c0_96 = arith.constant 0 : index
      %c0_97 = arith.constant 0 : index
      %c0_98 = arith.constant 0 : index
      %237 = vector.load %arg21[%c0_96, %c0_97, %c0_98] : memref<2x8x128xf32, #tpu.memory_space<vmem>>, vector<2x8x128xf32>
      tpu.vector_store %arg21[%c0_96, %c0_97, %c0_98], %236 {strides = array<i32>} : memref<2x8x128xf32, #tpu.memory_space<vmem>>, vector<2x8x128xf32>,
    } else {
    }
    return
  }
  func.func @transform_0(%arg0: i32, %arg1: i32) -> (i32, i32, i32) {
    %c0_i32 = arith.constant 0 : i32
    %c0_i32_0 = arith.constant 0 : i32
    %c0_i32_1 = arith.constant 0 : i32
    return %arg0, %c0_i32, %c0_i32_0 : i32, i32, i32
  }
  func.func @transform_1(%arg0: i32, %arg1: i32) -> (i32, i32) {
    %c0_i32 = arith.constant 0 : i32
    %c0_i32_0 = arith.constant 0 : i32
    %c0_i32_1 = arith.constant 0 : i32
    return %c0_i32, %c0_i32_0 : i32, i32
  }
  func.func @transform_2(%arg0: i32, %arg1: i32) -> (i32, i32) {
    %c0_i32 = arith.constant 0 : i32
    %c0_i32_0 = arith.constant 0 : i32
    %c0_i32_1 = arith.constant 0 : i32
    return %c0_i32, %c0_i32_0 : i32, i32
  }
  func.func @transform_3(%arg0: i32, %arg1: i32) -> (i32, i32, i32) {
    %c0_i32 = arith.constant 0 : i32
    %c0_i32_0 = arith.constant 0 : i32
    %c0_i32_1 = arith.constant 0 : i32
    return %arg1, %c0_i32, %c0_i32_0 : i32, i32, i32
  }
  func.func @transform_4(%arg0: i32, %arg1: i32) -> (i32, i32, i32) {
    %c0_i32 = arith.constant 0 : i32
    %c0_i32_0 = arith.constant 0 : i32
    %c0_i32_1 = arith.constant 0 : i32
    return %arg1, %c0_i32, %c0_i32_0 : i32, i32, i32
  }
  func.func @transform_5(%arg0: i32, %arg1: i32) -> (i32, i32, i32) {
    %c0_i32 = arith.constant 0 : i32
    %c0_i32_0 = arith.constant 0 : i32
    %c0_i32_1 = arith.constant 0 : i32
    return %arg1, %c0_i32, %c0_i32_0 : i32, i32, i32
  }
  func.func @transform_6(%arg0: i32, %arg1: i32) -> (i32, i32, i32) {
    %c0_i32 = arith.constant 0 : i32
    %c0_i32_0 = arith.constant 0 : i32
    %c0_i32_1 = arith.constant 0 : i32
    return %arg1, %c0_i32, %c0_i32_0 : i32, i32, i32
  }
  func.func @transform_7(%arg0: i32, %arg1: i32) -> (i32, i32, i32) {
    %c0_i32 = arith.constant 0 : i32
    %c0_i32_0 = arith.constant 0 : i32
    %c0_i32_1 = arith.constant 0 : i32
    return %arg1, %c0_i32, %c0_i32_0 : i32, i32, i32
  }
  func.func @transform_8(%arg0: i32, %arg1: i32) -> (i32, i32, i32) {
    %c0_i32 = arith.constant 0 : i32
    %c0_i32_0 = arith.constant 0 : i32
    %c0_i32_1 = arith.constant 0 : i32
    return %arg1, %c0_i32, %c0_i32_0 : i32, i32, i32
  }
  func.func @transform_9(%arg0: i32, %arg1: i32) -> (i32, i32, i32) {
    %c0_i32 = arith.constant 0 : i32
    %c0_i32_0 = arith.constant 0 : i32
    %c0_i32_1 = arith.constant 0 : i32
    return %arg1, %c0_i32, %c0_i32_0 : i32, i32, i32
  }
  func.func @transform_10(%arg0: i32, %arg1: i32) -> (i32, i32, i32) {
    %c0_i32 = arith.constant 0 : i32
    %c0_i32_0 = arith.constant 0 : i32
    %c0_i32_1 = arith.constant 0 : i32
    return %arg1, %c0_i32, %c0_i32_0 : i32, i32, i32
  }
  func.func @transform_11(%arg0: i32, %arg1: i32) -> (i32, i32, i32) {
    %c0_i32 = arith.constant 0 : i32
    %c0_i32_0 = arith.constant 0 : i32
    %c0_i32_1 = arith.constant 0 : i32
    return %arg1, %c0_i32, %c0_i32_0 : i32, i32, i32
  }
  func.func @transform_12(%arg0: i32, %arg1: i32) -> (i32, i32, i32) {
    %c0_i32 = arith.constant 0 : i32
    %c0_i32_0 = arith.constant 0 : i32
    %c0_i32_1 = arith.constant 0 : i32
    return %arg1, %c0_i32, %c0_i32_0 : i32, i32, i32
  }
  func.func @transform_13(%arg0: i32, %arg1: i32) -> (i32, i32, i32) {
    %c0_i32 = arith.constant 0 : i32
    %c0_i32_0 = arith.constant 0 : i32
    %c0_i32_1 = arith.constant 0 : i32
    return %arg1, %c0_i32, %c0_i32_0 : i32, i32, i32
  }
  func.func @transform_14(%arg0: i32, %arg1: i32) -> (i32, i32, i32) {
    %c0_i32 = arith.constant 0 : i32
    %c0_i32_0 = arith.constant 0 : i32
    %c0_i32_1 = arith.constant 0 : i32
    return %arg1, %c0_i32, %c0_i32_0 : i32, i32, i32
  }
  func.func @transform_15(%arg0: i32, %arg1: i32) -> (i32, i32, i32) {
    %c0_i32 = arith.constant 0 : i32
    %c0_i32_0 = arith.constant 0 : i32
    %c0_i32_1 = arith.constant 0 : i32
    return %arg1, %c0_i32, %c0_i32_0 : i32, i32, i32
  }
  func.func @transform_16(%arg0: i32, %arg1: i32) -> (i32, i32, i32) {
    %c0_i32 = arith.constant 0 : i32
    %c0_i32_0 = arith.constant 0 : i32
    %c0_i32_1 = arith.constant 0 : i32
    return %arg1, %c0_i32, %c0_i32_0 : i32, i32, i32
  }
  func.func @transform_17(%arg0: i32, %arg1: i32) -> (i32, i32) {
    %c0_i32 = arith.constant 0 : i32
    %c0_i32_0 = arith.constant 0 : i32
    %c0_i32_1 = arith.constant 0 : i32
    return %c0_i32, %c0_i32_0 : i32, i32
  }
  func.func @transform_18(%arg0: i32, %arg1: i32) -> (i32, i32) {
    %c0_i32 = arith.constant 0 : i32
    %c0_i32_0 = arith.constant 0 : i32
    %c0_i32_1 = arith.constant 0 : i32
    return %c0_i32, %c0_i32_0 : i32, i32
  }
  func.func @transform_19(%arg0: i32, %arg1: i32) -> (i32, i32, i32) {
    %c0_i32 = arith.constant 0 : i32
    %c0_i32_0 = arith.constant 0 : i32
    %c0_i32_1 = arith.constant 0 : i32
    return %arg0, %c0_i32, %c0_i32_0 : i32, i32, i32
  }
}

</mosaic_0001>

<bundles_post_ra>
// kernel: tpu_custom_call.1
= control target key start
LH: loop header
LB: loop body
LE: loop exit
PB: predicated region body
PF: predicated region fallthrough
CT: control target
= control target key end

     0   :  { %s3673_s0 = inlined_call_operand.hbm [shape: bf16[2,8,32], index: 0, kind: input, shape index: {}]   ;;  %s3674_s1 = inlined_call_operand.hbm [shape: bf16[32,64], index: 1, kind: input, shape index: {}]   ;;  %s3675_s2 = inlined_call_operand.hbm [shape: f32[1,64], index: 2, kind: input, shape index: {}]   ;;  %s3676_s3 = inlined_call_operand.vmem [shape: bf16[2,64,192], index: 3, kind: input, shape index: {}]   ;;  %s3677_s4 = inlined_call_operand.hbm [shape: f32[2,1,192], index: 4, kind: input, shape index: {}]   ;;  %s3678_s5 = inlined_call_operand.vmem [shape: bf16[2,64,64], index: 5, kind: input, shape index: {}]   ;;  %s3679_s6 = inlined_call_operand.vmem [shape: f32[2,1,64], index: 6, kind: input, shape index: {}]   ;;  %s3680_s7 = inlined_call_operand.hbm [shape: bf16[2,64,128], index: 7, kind: input, shape index: {}]   ;;  %s3681_s8 = inlined_call_operand.vmem [shape: f32[2,1,128], index: 8, kind: input, shape index: {}]   ;;  %s3682_s9 = inlined_call_operand.vmem [shape: bf16[2,128,64], index: 9, kind: input, shape index: {}]   ;;  %s3683_s10 = inlined_call_operand.vmem [shape: f32[2,1,64], index: 10, kind: input, shape index: {}]   ;;  %s3684_s11 = inlined_call_operand.vmem [shape: f32[2,1,64], index: 11, kind: input, shape index: {}]   ;;  %s3685_s12 = inlined_call_operand.vmem [shape: f32[2,1,64], index: 12, kind: input, shape index: {}]   ;;  %s3686_s13 = inlined_call_operand.hbm [shape: f32[2,1,64], index: 13, kind: input, shape index: {}]   ;;  %s3687_s14 = inlined_call_operand.hbm [shape: f32[2,1,64], index: 14, kind: input, shape index: {}]   ;;  %s3688_s15 = inlined_call_operand.vmem [shape: f32[2,1,64], index: 15, kind: input, shape index: {}]   ;;  %s3689_s16 = inlined_call_operand.vmem [shape: f32[2,1,64], index: 16, kind: input, shape index: {}]   ;;  %s3690_s17 = inlined_call_operand.hbm [shape: bf16[64,128], index: 17, kind: input, shape index: {}]   ;;  %s3691_s18 = inlined_call_operand.vmem [shape: f32[1,128], index: 18, kind: input, shape index: {}]   ;;  %s3692_s19 = inlined_call_operand.hbm [shape: f32[2,8,128], index: 19, kind: output, shape index: {}]  }
   0x1   :  { %3703 = sst [smem:[#allocation31_spill]] %s3673_s0 }
   0x2   :  { %3704 = sst [smem:[#allocation32_spill]] %s3674_s1 }
   0x3   :  { %3705 = sst [smem:[#allocation33_spill]] %s3675_s2 }
   0x4   :  { %3706 = sst [smem:[#allocation34_spill]] %s3676_s3 }
   0x5   :  { %3707 = sst [smem:[#allocation35_spill]] %s3677_s4 }
   0x6   :  { %3708 = sst [smem:[#allocation36_spill]] %s3678_s5 }
   0x7   :  { %3709 = sst [smem:[#allocation37_spill]] %s3680_s7 }
   0x8   :  { %3710 = sst [smem:[#allocation38_spill]] %s3682_s9 }
   0x9   :  { %3711 = sst [smem:[#allocation39_spill]] %s3683_s10 }
   0xa   :  { %3712 = sst [smem:[#allocation40_spill]] %s3684_s11 }
   0xb   :  { %3713 = sst [smem:[#allocation41_spill]] %s3685_s12 }
   0xc   :  { %3714 = sst [smem:[#allocation42_spill]] %s3686_s13 }
   0xd   :  { %3715 = sst [smem:[#allocation43_spill]] %s3687_s14 }
   0xe   :  { %3716 = sst [smem:[#allocation44_spill]] %s3688_s15 }
   0xf   :  { %3717 = sst [smem:[#allocation45_spill]] %s3689_s16 }
  0x10   :  { %3718 = sst [smem:[#allocation46_spill]] %s3690_s17 }
  0x11   :  { %3719 = sst [smem:[#allocation47_spill]] %s3691_s18 }
  0x12   :  { %3720 = sst [smem:[#allocation48_spill]] %s3692_s19 }
  0x13   :  { %24 = vsyncpa [#allocation4], 0 }
  0x14   :  { %25 = vsyncpa [#allocation7], 0 }
  0x15   :  { %26 = vsyncpa [#allocation10], 0 }
  0x16   :  { %28 = vsyncpa [#allocation10 + $0x1], 0 }
  0x17   :  { %29 = vsyncpa [#allocation13], 0 }
  0x18   :  { %31 = vsyncpa [#allocation13 + $0x1], 0 }
  0x19   :  { %32 = vsyncpa [#allocation16], 0 }
  0x1a   :  { %33 = vsyncpa [#allocation5], 0  ;;  %s3194_s0 = smov 0   ;;  %s3196_s30 = smov 0  }
  0x1b   :  { %s3198_s20 = smov 0   ;;  %s3200_s21 = smov 0  }
  0x1c   :  { %s3202_s1 = smov 0   ;;  %s3204_s22 = smov 0  }
  0x1d LB: > { %3721 = sst [smem:[#allocation24_spill]] %s3059_s30  ;;  %s3223_s2 = sadd.s32 4294967295, %s3075_s22   ;;  %s3075_s22 = sphi %s3204_s22, %s39_s22   ;;  %s3071_s1 = sphi %s3202_s1, %s3769_s1   ;;  %s3067_s21 = sphi %s3200_s21, %s3768_s21   ;;  %s3063_s20 = sphi %s3198_s20, %s3767_s20   ;;  %s3059_s30 = sphi %s3196_s30, %s3766_s30   ;;  %s3055_s0 = sphi %s3194_s0, %s3765_s0  }
  0x1e   : > { %3722 = sst [smem:[#allocation25_spill]] %s3063_s20  ;;  %p165_p0 = scmp.ne.s32.totalorder %s3059_s30, %s3055_s0 }
  0x1f   : > { %3723 = sst [smem:[#allocation26_spill]] %s3071_s1  ;;  %p166_p1 = scmp.eq.s32.totalorder %s3223_s2, 0 }
  0x20   : > { %3724 = sst [smem:[#allocation27_spill]] %s3075_s22  ;;  %p2336_p2 = scmp.ge.s32.totalorder %s3075_s22, 1 }
  0x21   : > { %3725 = sst [smem:[#allocation28_spill]] %s3223_s2  ;;  %p556_p3 = scmp.lt.s32.totalorder %s3075_s22, 3 }
  0x22   : > { %p3231_p4 = por %p166_p1, %p165_p0  ;;  %s3728_s26 = sld [smem:[#allocation32_spill]] }
  0x23   : > { %p3235_p5 = pnand %p2336_p2, %p556_p3  ;;  %s3077_s28 = smov [#allocation6]  }
  0x24   : > { %s586_s29 = sshll.u32 %s3077_s28, 4  ;;  %s3693_s25 = smov 64   ;;  %s587_s29 = int_to_ptr.vmem [resolvable:$true] %s586_s29 }
  0x25   : > { %p2578_p6 = pneg %p3235_p5  ;;  %s3695_s3 = smov 4  }
  0x26   : > { %s152_s28 = sadd.s32 1, %s3063_s20  ;;  %p159_p9 = scmp.ne.s32.totalorder %s3063_s20, %s3059_s30 }
  0x27   : > { %p3246_p7 = pnand %p2578_p6, %p166_p1  ;;  %p160_p10 = scmp.eq.s32.totalorder %s3075_s22, 0 }
  0x28   : > { %s584_s27 = sshll.u32 %s3728_s26, 4  ;;  %s48_s26 = sadd.s32 1, %s3071_s1  ;;  %s585_s27 = int_to_ptr.hbm [resolvable:$true] %s584_s27 }
  0x29   : > { %2584 = dma.hbm_to_vmem [thread:$0]  (!%p3246_p7), %s585_s27, 256, %s587_s29, [#allocation7], %s3693_s25, %s3693_s25, %s3695_s3  }
  0x2a   : > { %p49_p8 = scmp.ge.s32.totalorder %s48_s26, 2  ;;  %p3262_p11 = por %p160_p10, %p159_p9 }
  0x2b   : > { %p2608_p12 = scmp.lt.s32.totalorder %s3075_s22, 2  ;;  %s637_s16 = sand.u32 1, %s3075_s22  }
  0x2c   : > { %s3771_s26 = smov (%p49_p8, %s48_s26), 0  ;;  %s3271_s27 = sand.u32 1, %s3063_s20  }
  0x2d   : > { %3730 = sst [smem:[#allocation29_spill]] %s3771_s26  ;;  %s149_s18 = ssub.s32 %s3071_s1, %s3771_s26 }
  0x2e   : > { %p150_p13 = scmp.eq.s32.totalorder %s149_s18, 0  ;;  %s2343_s29 = sshll.u32 %s3071_s1, 1 }
  0x2f   : > { %s2342_s3 = sshll.u32 %s3271_s27, 1  ;;  %s3733_s4 = sld [smem:[#allocation35_spill]] }
  0x30   : > { %s3275_s25 = scalar_select %p150_p13, %s3063_s20, %s152_s28  }
  0x31   : > { %s641_s9 = scalar_lea.vmem [#allocation9], %s2342_s3  ;;  %p3285_p0 = pnand %p2608_p12, %p3262_p11 }
  0x32   : > { %3732 = sst [smem:[#allocation30_spill]] %s3275_s25  ;;  %s649_s26 = sshll.u32 %s641_s9, 4  ;;  %s650_s26 = int_to_ptr.vmem [resolvable:$true] %s649_s26 }
  0x33   : > { %s3290_s25 = scalar_lea.sflag [#allocation10], %s637_s16  ;;  %s3735_s13 = sld [smem:[#allocation42_spill]] }
  0x34   : > { %s727_s15 = scalar_lea.vmem [#allocation12], %s3271_s27  ;;  %s3736_s20 = sld [smem:[#allocation31_spill]] }
  0x35   : > { %s645_s11 = scalar_lea.hbm %s3733_s4, %s2343_s29  ;;  %s734_s19 = sshll.u32 %s727_s15, 4  ;;  %s735_s19 = int_to_ptr.vmem [resolvable:$true] %s734_s19 }
  0x36   : > { %s647_s10 = sshll.u32 %s645_s11, 4  ;;  %s3300_s29 = scalar_lea.sflag [#allocation13], %s637_s16  ;;  %s648_s10 = int_to_ptr.hbm [resolvable:$true] %s647_s10 }
  0x37   : > { %2594 = dma.hbm_to_vmem [thread:$0]  (!%p3285_p0), %s648_s10, 32, %s650_s26, %s3290_s25  }
  0x38   : > { %s3080_s26 = smov [#allocation3]   ;;  %s3738_s16 = smov 4  }
  0x39   : > { %s730_s9 = scalar_lea.hbm %s3735_s13, %s3071_s1  ;;  %s572_s12 = sshll.u32 %s3080_s26, 4  ;;  %s573_s12 = int_to_ptr.vmem [resolvable:$true] %s572_s12 }
  0x3a   : > { %s732_s3 = sshll.u32 %s730_s9, 4  ;;  %s570_s10 = sshll.u32 %s3736_s20, 4  ;;  %s733_s3 = int_to_ptr.hbm [resolvable:$true] %s732_s3  ;;  %s571_s10 = int_to_ptr.hbm [resolvable:$true] %s570_s10 }
  0x3b   : > { %2600 = dma.hbm_to_vmem [thread:$0]  (!%p3285_p0), %s733_s3, 16, %s735_s19, %s3300_s29  }
  0x3c   : > { %s3737_s9 = sld [smem:[#allocation33_spill]]  ;;  %s3739_s22 = smov 64  }
  0x3d   : > { %2581 = dma.hbm_to_vmem [thread:$0]  (!%p3246_p7), %s571_s10, 128, %s573_s12, [#allocation4], %s3739_s22, %s3739_s22, %s3738_s16  }
  0x3e   : > { %s3740_s17 = sld [smem:[#allocation46_spill]]  ;;  %s3081_s28 = smov [#allocation8]  }
  0x3f   : > { %s601_s3 = sshll.u32 %s3081_s28, 4  ;;  %s3082_s26 = smov [#allocation15]   ;;  %s602_s3 = int_to_ptr.vmem [resolvable:$true] %s601_s3 }
  0x40   : > { %s612_s11 = sshll.u32 %s3082_s26, 4  ;;  %s2515_s10 = sshll.u32 %s3071_s1, 5  ;;  %s613_s11 = int_to_ptr.vmem [resolvable:$true] %s612_s11 }
  0x41   : > { %s3741_s7 = sld [smem:[#allocation37_spill]]  ;;  %s3742_s19 = sshll.u32 %s3271_s27, 5 }
  0x42   : > { %s599_s13 = sshll.u32 %s3737_s9, 4  ;;  %s674_s4 = scalar_lea.vmem [#allocation11], %s3742_s19  ;;  %s600_s13 = int_to_ptr.hbm [resolvable:$true] %s599_s13 }
  0x43   : > { %2587 = dma.hbm_to_vmem [thread:$0]  (!%p3246_p7), %s600_s13, 16, %s602_s3, [#allocation7]  }
  0x44   : > { %s610_s20 = sshll.u32 %s3740_s17, 4  ;;  %s682_s28 = sshll.u32 %s674_s4, 4  ;;  %s611_s20 = int_to_ptr.hbm [resolvable:$true] %s610_s20  ;;  %s683_s28 = int_to_ptr.vmem [resolvable:$true] %s682_s28 }
  0x45   : > { %2590 = dma.hbm_to_vmem [thread:$0]  (!%p3246_p7), %s611_s20, 512, %s613_s11, [#allocation16], %s3739_s22, %s3739_s22, %s3738_s16  }
  0x46   : > { %s3743_s14 = sld [smem:[#allocation43_spill]]  ;;  %s744_s20 = scalar_lea.vmem [#allocation14], %s3271_s27 }
  0x47   : > { %s679_s9 = scalar_lea.hbm %s3741_s7, %s2515_s10  ;;  %s751_s26 = sshll.u32 %s744_s20, 4  ;;  %s752_s26 = int_to_ptr.vmem [resolvable:$true] %s751_s26 }
  0x48   : > { %s680_s17 = sshll.u32 %s679_s9, 4  ;;  %s681_s17 = int_to_ptr.hbm [resolvable:$true] %s680_s17 }
  0x49   : > { %2597 = dma.hbm_to_vmem [thread:$0]  (!%p3285_p0), %s681_s17, 512, %s683_s28, %s3290_s25, %s3739_s22, %s3739_s22, %s3738_s16  }
  0x4a   : > { %772 = sbr.rel (%p3235_p5) target bundleno = 3399 (0xd47), region = 96 }
  0x4c   : > { %s747_s3 = scalar_lea.hbm %s3743_s14, %s3071_s1 }
  0x4d   : > { %s749_s11 = sshll.u32 %s747_s3, 4  ;;  %s750_s11 = int_to_ptr.hbm [resolvable:$true] %s749_s11 }
  0x4e   : > { %2603 = dma.hbm_to_vmem [thread:$0]  (!%p3285_p0), %s750_s11, 16, %s752_s26, %s3300_s29  }
  0x4f   : > { %3030 = dma.done.wait (%p166_p1), [#allocation4], 128  }
  0x50   : > { %3032 = vsyncadd (%p166_p1), [#allocation4], 4294967168 }
  0x51   : > { %3034 = dma.done.wait (%p166_p1), [#allocation7], 272  }
  0x52   : > { %3036 = vsyncadd (%p166_p1), [#allocation7], 4294967024  ;;  %s789_s17 = sand.u32 1, %s3223_s2   ;;  %s3358_s22 = sand.u32 1, %s3059_s30  }
  0x53   : > { %s2351_s24 = sshll.u32 %s3358_s22, 1  ;;  %s790_s25 = scalar_lea.sflag [#allocation10], %s789_s17 }
  0x54   : > { %s3361_s27 = scalar_lea.vmem [#allocation9], %s2351_s24 }
  0x55   : > { %3038 = dma.done.wait (%p3231_p4), %s790_s25, 544  }
  0x56   : > { %3040 = vsyncadd (%p3231_p4), %s790_s25, 4294966752  ;;  %s2352_s18 = sshll.u32 %s3358_s22, 5  ;;  %s810_s16 = scalar_lea.sflag [#allocation13], %s789_s17 }
  0x57   : > { %s3368_s29 = scalar_lea.vmem [#allocation11], %s2352_s18 }
  0x58   : > { %3042 = dma.done.wait (%p3231_p4), %s810_s16, 32  }
  0x59   : > { %3044 = vsyncadd (%p3231_p4), %s810_s16, 4294967264 }
  0x5a   : > { %3046 = dma.done.wait (%p166_p1), [#allocation16], 512  }
  0x5b   : > { %3048 = vsyncadd (%p166_p1), [#allocation16], 4294966784  ;;  %p927_p2 = scmp.lt.s32.totalorder %s3067_s21, 1  ;;  %s3744_s28 = sld [smem:[#allocation34_spill]] }
  0x5c   : > { %s3745_s5 = sld [smem:[#allocation36_spill]]  ;;  %p2360_p1 = scmp.ne.s32.totalorder %s3067_s21, 0 }
  0x5d   : > { %s3382_s15 = scalar_select %p927_p2, %s3067_s21, 1 }
  0x5e   : > { %s3746_s10 = sld [smem:[#allocation38_spill]] }
  0x5f   : > { %s2516_s23 = sshll.u32 %s3382_s15, 6  ;;  %s2517_s9 = sshll.u32 %s3382_s15, 5 }
  0x60   : > { %s3748_s3 = sld [smem:[#allocation40_spill]] }
  0x61   : > { %s3389_s13 = scalar_lea.vmem %s3744_s28, %s2516_s23  ;;  %s3747_s28 = sld [smem:[#allocation39_spill]] }
  0x62   : > { %s3394_s20 = scalar_lea.vmem %s3745_s5, %s2517_s9  ;;  %s3749_s11 = sld [smem:[#allocation41_spill]] }
  0x63   : > { %s3750_s25 = sld [smem:[#allocation44_spill]] }
  0x64   : > { %s3407_s7 = scalar_lea.vmem %s3746_s10, %s2516_s23  ;;  %s3751_s10 = sld [smem:[#allocation45_spill]] }
  0x66   : > { %s953_s5 = scalar_lea.vmem %s3748_s3, %s3382_s15  ;;  %968 = sbr.rel (%p2360_p1) target bundleno = 254 (0xfe), region = 132 }
  0x67   : > { %s950_s14 = scalar_lea.vmem %s3747_s28, %s3382_s15 }
  0x68   : > { %s956_s17 = scalar_lea.vmem %s3749_s11, %s3382_s15 }
  0x69   : > { %s959_s18 = scalar_lea.vmem %s3750_s25, %s3382_s15 }
  0x6a   : > { %s962_s23 = scalar_lea.vmem %s3751_s10, %s3382_s15 }
  0x6b   : > { %v2521_v0 = vld [vmem:[#allocation6 + $0x8] sm:$0xff]  ;;  %v2520_v1 = vld [vmem:[#allocation6] sm:$0xff]  ;;  %v2519_v2 = vld [vmem:[#allocation3] sm:$0xff]  ;;  %vm996_vm0 = vcmask 261120   ;;  %vm1016_vm1 = vcmask 523264  }
  0x6c   : > { %1006 = vmatpush.bf16.msra.mxu0 %v2521_v0  ;;  %v2680_v3 = vld [vmem:[#allocation8] ss:$0 sm:$0xff] }
  0x70   : > { %1007 = vmatpush.bf16.msra.mxu0 %v2520_v1 }
  0x73   : > { %2373 = vmatmul.msk.bf16.vlgmr.msra.gmra.mxu0 %vm996_vm0, %v2519_v2 }
  0xf0   : > { %v1009_v4 = vpop.f32.mrf.mxu0 }
  0xf1   : > { %v1010_v5 = vadd.f32 %v2680_v3, %v1009_v4 }
  0xf3   : > { %v1014_v6 = vmax.f32 %v1010_v5, 0.0 }
  0xf5   : > { %1017 = vst.msk [vmem:[#allocation2] sm:$0xff] %vm1016_vm1, %v1014_v6 }
  0xf8   : > { %v1011_v7 = vpop.f32.mrf.mxu0 }
  0xf9   : > { %v1012_v8 = vadd.f32 %v2680_v3, %v1011_v7 }
  0xfb   : > { %v1015_v9 = vmax.f32 %v1012_v8, 0.0 }
  0xfd   : > { %1018 = vst.msk [vmem:[#allocation2 + $0x8] sm:$0xff] %vm1016_vm1, %v1015_v9 }
  0xfe PF: > { %v2400_v10 = vld [vmem:[%s3389_s13 + $0x30] sm:$0xf]  ;;  %v2529_v11 = vld [vmem:[%s3389_s13 + $0x34] sm:$0xf0]  ;;  %v2392_v12 = vld [vmem:[%s3389_s13 + $0x20] sm:$0xf]  ;;  %s3752_s0 = scalar_lea.vmem %s3679_s6, %s3382_s15  ;;  %s3755_s24 = scalar_lea.vmem %s3681_s8, %s3382_s15 }
  0xff   : > { %v2401_v13 = vor.u32 %v2529_v11, %v2400_v10  ;;  %v2527_v14 = vld [vmem:[%s3389_s13 + $0x24] sm:$0xf0]  ;;  %v2384_v16 = vld [vmem:[%s3389_s13 + $0x10] sm:$0xf]  ;;  %v2528_v17 = vld [vmem:[%s3389_s13 + $0x34] sm:$0xf] }
 0x100   : > { %v2393_v15 = vor.u32 %v2527_v14, %v2392_v12  ;;  %v2402_v18 = vld [vmem:[%s3389_s13 + $0x38] sm:$0xf0]  ;;  %v2525_v19 = vld [vmem:[%s3389_s13 + $0x14] sm:$0xf0]  ;;  %v2526_v21 = vld [vmem:[%s3389_s13 + $0x24] sm:$0xf] }
 0x101   : > { %1084 = vmatpush.bf16.msra.mxu0 %v2401_v13  ;;  %v2405_v20 = vor.u32 %v2528_v17, %v2402_v18  ;;  %v2394_v22 = vld [vmem:[%s3389_s13 + $0x28] sm:$0xf0]  ;;  %v2376_v23 = vld [vmem:[%s3389_s13] sm:$0xf]  ;;  %v2523_v24 = vld [vmem:[%s3389_s13 + $0x4] sm:$0xf0]  ;;  %v2385_v27 = vor.u32 %v2525_v19, %v2384_v16 }
 0x102   : > { %v2397_v25 = vor.u32 %v2526_v21, %v2394_v22  ;;  %v2524_v26 = vld [vmem:[%s3389_s13 + $0x14] sm:$0xf]  ;;  %v2386_v28 = vld [vmem:[%s3389_s13 + $0x18] sm:$0xf0]  ;;  %v3444_v29 = vld [vmem:[#allocation2] sm:$0xff]  ;;  %v2377_v31 = vor.u32 %v2523_v24, %v2376_v23  ;;  %vm1076_vm2 = vcmask 523264  }
 0x103   : > { %1098 = vmatpush.bf16.msra.mxu1 %v2405_v20  ;;  %v2389_v30 = vor.u32 %v2524_v26, %v2386_v28  ;;  %v2522_v33 = vld [vmem:[%s3389_s13 + $0x4] sm:$0xf]  ;;  %v2378_v34 = vld [vmem:[%s3389_s13 + $0x8] sm:$0xf0]  ;;  %s3083_s30 = smov 48   ;;  %s3084_s1 = smov 64  }
 0x104   : > { %v3446_v32 = vld [vmem:[#allocation2 + $0x8] sm:$0xff]  ;;  %v2381_v36 = vor.u32 %v2522_v33, %v2378_v34  ;;  %s3085_s2 = smov 112   ;;  %vm1193_vm3 = vcmask 1043456   ;;  %vm1121_vm4 = vcmask 130048   ;;  %vm1165_vm5 = vcmask 64512   ;;  %s3087_s13 = smov 96  }
 0x105   : > { %1085 = vmatpush.bf16.msra.mxu0 %v2393_v15  ;;  %v1021_v35 = vpack.c.bf16 %v3446_v32, %v3444_v29  ;;  %v3455_v37 = vld [vmem:[%s3361_s27] sm:$0x3]  ;;  %s3086_s27 = smov 32   ;;  %s3088_s16 = smov 80  }
 0x106   : > { %v1032_v38 = vperm.slane %v3455_v37, 0  ;;  %v1033_v49 = vperm.slane %v3455_v37, 1  ;;  %s3089_s19 = smov 16   ;;  %p2493_p3 = scmp.ne.s32.totalorder %s3067_s21, 1 }
 0x107   : > { %1099 = vmatpush.bf16.msra.mxu1 %v2397_v25 }
 0x109   : > { %1086 = vmatpush.bf16.msra.mxu0 %v2385_v27 }
 0x10b   : > { %1100 = vmatpush.bf16.msra.mxu1 %v2389_v30 }
 0x10d   : > { %1087 = vmatpush.bf16.msra.mxu0 %v2377_v31 }
 0x10f   : > { %1101 = vmatpush.bf16.msra.mxu1 %v2381_v36 }
 0x110   : > { %2406 = vmatmul.msk.bf16.vlgmr.msra.gmra.mxu0 %vm1076_vm2, %v1021_v35 }
 0x112   : > { %2407 = vmatmul.msk.bf16.vlgmr.msra.gmra.mxu1 %vm1076_vm2, %v1021_v35 }
 0x18d   : > { %v1089_v39 = vpop.f32.mrf.mxu0 }
 0x18e   : > { %v1090_v40 = vadd.f32 %v1089_v39, %v1032_v38  ;;  %v2530_v39 = vld [vmem:[%s3394_s20] sm:$0xff] }
 0x18f   : > { %v1103_v50 = vpop.f32.mrf.mxu1  ;;  %1248 = vmatpush.bf16.msrb.mxu0 %v2530_v39 }
 0x190   : > { %v1112_v41 = vpack.c.bf16 %v1090_v40, %v1090_v40  ;;  %v1104_v51 = vadd.f32 %v1103_v50, %v1033_v49 }
 0x192   : > { %v1117_v42 = vunpack.c.l.b16 %v1112_v41  ;;  %v1114_v52 = vpack.c.bf16 %v1104_v51, %v1104_v51 }
 0x194   : > { %v3458_v43 = vpack.c.b16 %v1117_v42, %v1117_v42  ;;  %v1195_v54 = vsel %vm1193_vm3, %v1114_v52, 0  ;;  %v1328_v15 = vunpack.c.l.b16 %v1114_v52 }
 0x195   : > { %v1091_v44 = vpop.f32.mrf.mxu0 }
 0x196   : > { %v1092_v45 = vadd.f32 %v1091_v44, %v1032_v38  ;;  %1259 = vrot.lane.b32.xlu2 %v3458_v43, %s3083_s30  ;;  %1119 = vrot.lane.b32.xlu0 %v3458_v43, %s3084_s1  ;;  %v3484_v16 = vpack.c.b16 %v1328_v15, %v1328_v15 }
 0x197   : > { %v1105_v17 = vpop.f32.mrf.mxu1 }
 0x198   : > { %v1113_v46 = vpack.c.bf16 %v1092_v45, %v1092_v45  ;;  %v1106_v18 = vadd.f32 %v1105_v17, %v1033_v49 }
 0x19a   : > { %v1142_v47 = vunpack.c.l.b16 %v1113_v46  ;;  %v1115_v19 = vpack.c.bf16 %v1106_v18, %v1106_v18 }
 0x19c   : > { %v3462_v48 = vpack.c.b16 %v1142_v47, %v1142_v47  ;;  %v1214_v20 = vsel %vm1193_vm3, %v1115_v19, 0  ;;  %v1352_v52 = vunpack.c.l.b16 %v1115_v19 }
 0x19e   : > { %1144 = vrot.lane.b32.xlu1 %v3462_v48, %s3084_s1  ;;  %1257 = vrot.lane.b32.xlu2 %v3458_v43, %s3085_s2 }
 0x1a6   : > { %1282 = vrot.lane.b32.xlu2 %v3462_v48, %s3083_s30 }
 0x1ae   : > { %1280 = vrot.lane.b32.xlu2 %v3462_v48, %s3085_s2 }
 0x1f0   : > { %v1260_v56 = vpop.permute.xlu2 %1259 }
 0x1f1   : > { %v1265_v58 = vsel %vm1121_vm4, %v1260_v56, 0 }
 0x1f8   : > { %v1258_v2 = vpop.permute.xlu2 %1257 }
 0x200   : > { %v1283_v3 = vpop.permute.xlu2 %1282 }
 0x201   : > { %v1288_v26 = vsel %vm1121_vm4, %v1283_v3, 0 }
 0x208   : > { %v1120_v53 = vpop.permute.xlu0 %1119  ;;  %v1281_v4 = vpop.permute.xlu2 %1280 }
 0x209   : > { %v1126_v55 = vsel %vm1121_vm4, %v1120_v53, 0 }
 0x20a   : > { %1135 = vmatpush.bf16.xpose.msra.mxu2 %v1126_v55 }
 0x210   : > { %v1145_v57 = vpop.permute.xlu1 %1144 }
 0x211   : > { %2408 = vmatmul.msk.bf16.vlgmr.msra.gmra.mxu2 %vm1121_vm4, %v1112_v41  ;;  %v1150_v59 = vsel %vm1121_vm4, %v1145_v57, 0 }
 0x212   : > { %1204 = vmatpush.bf16.msrb.mxu2 %v1195_v54  ;;  %1159 = vmatpush.bf16.xpose.msra.mxu3 %v1150_v59  ;;  %v3505_v54 = vpack.c.b16 %v1352_v52, %v1352_v52 }
 0x216   : > { %1274 = vmatpush.bf16.xpose.msra.mxu2 %v1265_v58  ;;  %v2531_v58 = vld [vmem:[%s3394_s20 + $0x8] sm:$0xff] }
 0x217   : > { %1394 = vmatpush.bf16.msrb.mxu1 %v2531_v58 }
 0x219   : > { %2409 = vmatmul.msk.bf16.vlgmr.msra.gmra.mxu3 %vm1121_vm4, %v1113_v46 }
 0x21a   : > { %1223 = vmatpush.bf16.msrb.mxu3 %v1214_v20 }
 0x294   : > { %v1137_v60 = vpop.f32.mrf.mxu2 }
 0x295   : > { %v1166_v61 = vsel %vm1165_vm5, %v1137_v60, -inf }
 0x296   : > { %1167 = vmax.xlane.f32.xlu0 %v1166_v61 }
 0x29c   : > { %v1139_v62 = vpop.f32.mrf.mxu2  ;;  %v1161_v63 = vpop.f32.mrf.mxu3 }
 0x29d   : > { %v1169_v0 = vsel %vm1165_vm5, %v1161_v63, -inf }
 0x29e   : > { %1170 = vmax.xlane.f32.xlu2 %v1169_v0 }
 0x2a4   : > { %v1163_v1 = vpop.f32.mrf.mxu3 }
 0x2aa   : > { %1405 = vrot.lane.b32.xlu0 %v3458_v43, %s3086_s27 }
 0x309   : > { %v1168_v5 = vpop.xlane.xlu0 %1167 }
 0x30a   : > { %v1172_v6 = vsub.f32 %v1137_v60, %v1168_v5 }
 0x30c   : > { %v1174_v7 = vmul.f32 1.442695, %v1172_v6 }
 0x30e   : > { %2690 = vpow2.f32 %v1174_v7 }
 0x311   : > { %v1171_v8 = vpop.xlane.xlu2 %1170 }
 0x312   : > { %v1173_v9 = vsub.f32 %v1161_v63, %v1171_v8 }
 0x314   : > { %v2691_v10 = vpop.eup %2690  ;;  %v1176_v11 = vmul.f32 1.442695, %v1173_v9 }
 0x315   : > { %v1178_v12 = vsel %vm1165_vm5, %v2691_v10, 0.0 }
 0x316   : > { %2692 = vpow2.f32 %v1176_v11  ;;  %1179 = vadd.xlane.f32.xlu1 %v1178_v12 }
 0x31c   : > { %v2693_v13 = vpop.eup %2692  ;;  %v1406_v35 = vpop.permute.xlu0 %1405 }
 0x31d   : > { %v1181_v14 = vsel %vm1165_vm5, %v2693_v13, 0.0  ;;  %v1411_v37 = vsel %vm1121_vm4, %v1406_v35, 0 }
 0x31e   : > { %1182 = vadd.xlane.f32.xlu2 %v1181_v14 }
 0x32f   : > { %1403 = vrot.lane.b32.xlu1 %v3458_v43, %s3087_s13 }
 0x336   : > { %1330 = vrot.lane.b32.xlu2 %v3484_v16, %s3085_s2 }
 0x33e   : > { %1428 = vrot.lane.b32.xlu2 %v3462_v48, %s3086_s27 }
 0x389   : > { %v1180_v21 = vpop.xlane.xlu1 %1179 }
 0x38a   : > { %2694 = vrcp.f32 %v1180_v21 }
 0x390   : > { %v2695_v22 = vpop.eup %2694 }
 0x391   : > { %v1186_v23 = vmul.f32 %v2695_v22, %v2691_v10  ;;  %v1183_v24 = vpop.xlane.xlu2 %1182 }
 0x392   : > { %2696 = vrcp.f32 %v1183_v24 }
 0x393   : > { %v1188_v25 = vpack.c.bf16 %v1186_v23, %v1186_v23 }
 0x395   : > { %2410 = vmatmul.msk.bf16.vlgmr.msrb.gmra.mxu2 %vm1165_vm5, %v1188_v25 }
 0x396   : > { %1297 = vmatpush.bf16.xpose.msrb.mxu2 %v1288_v26 }
 0x398   : > { %v2697_v27 = vpop.eup %2696 }
 0x399   : > { %v1187_v28 = vmul.f32 %v2697_v27, %v2693_v13  ;;  %v1331_v30 = vpop.permute.xlu2 %1330 }
 0x39a   : > { %v1336_v31 = vsel %vm1193_vm3, %v1331_v30, 0 }
 0x39b   : > { %v1189_v33 = vpack.c.bf16 %v1187_v28, %v1187_v28  ;;  %1345 = vmatpush.bf16.msra.mxu3 %v1336_v31 }
 0x39d   : > { %2411 = vmatmul.msk.bf16.vlgmr.msrb.gmra.mxu3 %vm1165_vm5, %v1189_v33 }
 0x3a1   : > { %v1429_v34 = vpop.permute.xlu2 %1428  ;;  %v1404_v38 = vpop.permute.xlu1 %1403 }
 0x3a2   : > { %v1434_v36 = vsel %vm1121_vm4, %v1429_v34, 0 }
 0x3a3   : > { %1443 = vmatpush.bf16.xpose.msrb.mxu3 %v1434_v36 }
 0x3a5   : > { %2417 = vmatmul.msk.bf16.vlgmr.msra.gmra.mxu2 %vm1121_vm4, %v1258_v2 }
 0x3a6   : > { %1420 = vmatpush.bf16.xpose.msra.mxu2 %v1411_v37 }
 0x3b5   : > { %2418 = vmatmul.msk.bf16.vlgmr.msrb.gmra.mxu2 %vm1121_vm4, %v1281_v4 }
 0x3c5   : > { %2426 = vmatmul.msk.bf16.vlgmr.msra.gmra.mxu2 %vm1121_vm4, %v1404_v38 }
 0x418   : > { %v1206_v40 = vpop.f32.mrf.mxu2 }
 0x420   : > { %v1208_v41 = vpop.f32.mrf.mxu2  ;;  %v1225_v42 = vpop.f32.mrf.mxu3 }
 0x421   : > { %v1229_v44 = vpack.c.bf16 %v1225_v42, %v1206_v40 }
 0x423   : > { %2416 = vmatmul.msk.bf16.vlgmr.msrb.gmra.mxu0 %vm1121_vm4, %v1229_v44 }
 0x428   : > { %v1227_v45 = vpop.f32.mrf.mxu3  ;;  %v1276_v46 = vpop.f32.mrf.mxu2 }
 0x429   : > { %v1303_v47 = vsel %vm1165_vm5, %v1276_v46, -inf }
 0x42a   : > { %1304 = vmax.xlane.f32.xlu0 %v1303_v47 }
 0x430   : > { %v1278_v49 = vpop.f32.mrf.mxu2 }
 0x431   : > { %v3546_v49 = vld [vmem:[%s3752_s0] ss:$0 sm:$0xff] }
 0x438   : > { %v1299_v50 = vpop.f32.mrf.mxu2 }
 0x439   : > { %v1306_v51 = vsel %vm1165_vm5, %v1299_v50, -inf }
 0x43a   : > { %1307 = vmax.xlane.f32.xlu2 %v1306_v51 }
 0x43e   : > { %1426 = vrot.lane.b32.xlu0 %v3462_v48, %s3087_s13 }
 0x440   : > { %v1301_v53 = vpop.f32.mrf.mxu2 }
 0x446   : > { %1354 = vrot.lane.b32.xlu0 %v3505_v54, %s3085_s2 }
 0x448   : > { %v1422_v55 = vpop.f32.mrf.mxu2 }
 0x449   : > { %v1449_v3 = vsel %vm1165_vm5, %v1422_v55, -inf }
 0x44e   : > { %1473 = vrot.lane.b32.xlu0 %v3484_v16, %s3087_s13 }
 0x450   : > { %v1424_v56 = vpop.f32.mrf.mxu2 }
 0x452   : > { %1543 = vrot.lane.b32.xlu2 %v3458_v43, %s3088_s16 }
 0x456   : > { %1568 = vrot.lane.b32.xlu0 %v3462_v48, %s3089_s19 }
 0x45a   : > { %1494 = vrot.lane.b32.xlu2 %v3505_v54, %s3087_s13 }
 0x45e   : > { %1566 = vrot.lane.b32.xlu0 %v3462_v48, %s3088_s16 }
 0x49d   : > { %v1305_v57 = vpop.xlane.xlu0 %1304 }
 0x49e   : > { %v1309_v59 = vsub.f32 %v1276_v46, %v1305_v57 }
 0x4a0   : > { %v1311_v60 = vmul.f32 1.442695, %v1309_v59  ;;  %v1250_v28 = vpop.f32.mrf.mxu0 }
 0x4a1   : > { %v1255_v53 = vadd.f32 %v3546_v49, %v1250_v28 }
 0x4a2   : > { %2698 = vpow2.f32 %v1311_v60 }
 0x4a8   : > { %v2699_v61 = vpop.eup %2698  ;;  %v3533_v35 = vpop.f32.mrf.mxu0 }
 0x4a9   : > { %v1315_v62 = vsel %vm1165_vm5, %v2699_v61, 0.0 }
 0x4aa   : > { %1316 = vadd.xlane.f32.xlu1 %v1315_v62 }
 0x4ad   : > { %v1308_v63 = vpop.xlane.xlu2 %1307 }
 0x4ae   : > { %v1310_v0 = vsub.f32 %v1299_v50, %v1308_v63 }
 0x4b0   : > { %v1313_v1 = vmul.f32 1.442695, %v1310_v0  ;;  %v1427_v2 = vpop.permute.xlu0 %1426 }
 0x4b2   : > { %2700 = vpow2.f32 %v1313_v1  ;;  %1450 = vmax.xlane.f32.xlu1 %v1449_v3 }
 0x4b5   : > { %v1544_v4 = vpop.permute.xlu2 %1543 }
 0x4b8   : > { %v2701_v48 = vpop.eup %2700  ;;  %v1355_v5 = vpop.permute.xlu0 %1354 }
 0x4b9   : > { %v1360_v6 = vsel %vm1193_vm3, %v1355_v5, 0  ;;  %v1318_v7 = vsel %vm1165_vm5, %v2701_v48, 0.0 }
 0x4ba   : > { %1369 = vmatpush.bf16.msra.mxu0 %v1360_v6  ;;  %1319 = vadd.xlane.f32.xlu1 %v1318_v7 }
 0x4bd   : > { %v1495_v8 = vpop.permute.xlu2 %1494 }
 0x4be   : > { %v1500_v9 = vsel %vm1193_vm3, %v1495_v8, 0 }
 0x4bf   : > { %1509 = vmatpush.bf16.msra.mxu1 %v1500_v9 }
 0x4c0   : > { %v1474_v10 = vpop.permute.xlu0 %1473 }
 0x4c1   : > { %v1479_v11 = vsel %vm1193_vm3, %v1474_v10, 0 }
 0x4c2   : > { %1488 = vmatpush.bf16.msrb.mxu0 %v1479_v11 }
 0x4c8   : > { %v1569_v25 = vpop.permute.xlu0 %1568 }
 0x4c9   : > { %v1574_v27 = vsel %vm1121_vm4, %v1569_v25, 0 }
 0x4d0   : > { %v1567_v45 = vpop.permute.xlu0 %1566 }
 0x51d   : > { %v1317_v12 = vpop.xlane.xlu1 %1316 }
 0x51e   : > { %2702 = vrcp.f32 %v1317_v12 }
 0x524   : > { %v2703_v13 = vpop.eup %2702 }
 0x525   : > { %v1323_v14 = vmul.f32 %v2703_v13, %v2699_v61  ;;  %v1451_v15 = vpop.xlane.xlu1 %1450 }
 0x526   : > { %v1455_v17 = vsub.f32 %v1422_v55, %v1451_v15  ;;  %v2532_v15 = vld [vmem:[%s3394_s20 + $0x10] sm:$0xff] }
 0x527   : > { %v1325_v18 = vpack.c.bf16 %v1323_v14, %v1323_v14  ;;  %1534 = vmatpush.bf16.msrb.mxu2 %v2532_v15  ;;  %v2544_v15 = vld [vmem:[%s3407_s7 + $0x30] sm:$0xff] }
 0x528   : > { %v1457_v19 = vmul.f32 1.442695, %v1455_v17 }
 0x529   : > { %2419 = vmatmul.msk.bf16.vlgmr.msra.gmra.mxu3 %vm1165_vm5, %v1325_v18 }
 0x52a   : > { %2704 = vpow2.f32 %v1457_v19 }
 0x52d   : > { %v1320_v20 = vpop.xlane.xlu1 %1319 }
 0x52e   : > { %2706 = vrcp.f32 %v1320_v20 }
 0x530   : > { %v2705_v21 = vpop.eup %2704 }
 0x531   : > { %v1461_v22 = vsel %vm1165_vm5, %v2705_v21, 0.0 }
 0x532   : > { %1462 = vadd.xlane.f32.xlu1 %v1461_v22 }
 0x534   : > { %v2707_v23 = vpop.eup %2706 }
 0x535   : > { %v1324_v24 = vmul.f32 %v2707_v23, %v2701_v48 }
 0x537   : > { %v1326_v26 = vpack.c.bf16 %v1324_v24, %v1324_v24 }
 0x539   : > { %2420 = vmatmul.msk.bf16.vlgmr.msra.gmra.mxu0 %vm1165_vm5, %v1326_v26  ;;  %2427 = vmatmul.msk.bf16.vlgmr.msrb.gmra.mxu3 %vm1121_vm4, %v1427_v2 }
 0x53a   : > { %1583 = vmatpush.bf16.xpose.msra.mxu0 %v1574_v27 }
 0x54b   : > { %1545 = vrot.lane.b32.xlu1 %v3458_v43, %s3089_s19 }
 0x5a5   : > { %v1463_v30 = vpop.xlane.xlu1 %1462 }
 0x5a6   : > { %2708 = vrcp.f32 %v1463_v30 }
 0x5ac   : > { %v2709_v31 = vpop.eup %2708  ;;  %v1347_v33 = vpop.f32.mrf.mxu3 }
 0x5ad   : > { %v1469_v34 = vmul.f32 %v2709_v31, %v2705_v21 }
 0x5af   : > { %v1471_v36 = vpack.c.bf16 %v1469_v34, %v1469_v34 }
 0x5b1   : > { %2428 = vmatmul.msk.bf16.vlgmr.msrb.gmra.mxu0 %vm1165_vm5, %v1471_v36 }
 0x5b4   : > { %v1349_v37 = vpop.f32.mrf.mxu3 }
 0x5b6   : > { %v1371_v38 = vpop.f32.mrf.mxu0 }
 0x5b7   : > { %v1375_v39 = vpack.c.bf16 %v1371_v38, %v1347_v33  ;;  %v2533_v33 = vld [vmem:[%s3394_s20 + $0x18] sm:$0xff] }
 0x5b9   : > { %2425 = vmatmul.msk.bf16.vlgmr.msrb.gmra.mxu1 %vm1121_vm4, %v1375_v39 }
 0x5bc   : > { %v1445_v40 = vpop.f32.mrf.mxu3 }
 0x5bd   : > { %v1546_v41 = vpop.permute.xlu1 %1545  ;;  %v1452_v43 = vsel %vm1165_vm5, %v1445_v40, -inf }
 0x5be   : > { %v1551_v42 = vsel %vm1121_vm4, %v1546_v41, 0  ;;  %1453 = vmax.xlane.f32.xlu0 %v1452_v43  ;;  %v1373_v44 = vpop.f32.mrf.mxu0 }
 0x5bf   : > { %1560 = vmatpush.bf16.xpose.msra.mxu3 %v1551_v42 }
 0x5c1   : > { %2436 = vmatmul.msk.bf16.vlgmr.msra.gmra.mxu0 %vm1121_vm4, %v1567_v45  ;;  %v1256_v45 = vadd.f32 %v3546_v49, %v3533_v35 }
 0x5c4   : > { %v1447_v46 = vpop.f32.mrf.mxu3 }
 0x5c6   : > { %2435 = vmatmul.msk.bf16.vlgmr.msra.gmra.mxu3 %vm1121_vm4, %v1544_v4 }
 0x5c7   : > { %1674 = vmatpush.bf16.msrb.mxu3 %v2533_v33 }
 0x62e   : > { %v1490_v47 = vpop.f32.mrf.mxu0 }
 0x631   : > { %v1454_v50 = vpop.xlane.xlu0 %1453 }
 0x632   : > { %v1456_v51 = vsub.f32 %v1445_v40, %v1454_v50 }
 0x634   : > { %v1459_v52 = vmul.f32 1.442695, %v1456_v51 }
 0x636   : > { %2710 = vpow2.f32 %v1459_v52  ;;  %v1396_v55 = vpop.f32.mrf.mxu1  ;;  %v1492_v56 = vpop.f32.mrf.mxu0 }
 0x637   : > { %v1401_v57 = vadd.f32 %v1396_v55, %v1255_v53 }
 0x63c   : > { %v2711_v58 = vpop.eup %2710 }
 0x63d   : > { %v1464_v59 = vsel %vm1165_vm5, %v2711_v58, 0.0 }
 0x63e   : > { %1465 = vadd.xlane.f32.xlu1 %v1464_v59  ;;  %v1585_v60 = vpop.f32.mrf.mxu0  ;;  %v1398_v17 = vpop.f32.mrf.mxu1 }
 0x63f   : > { %v1592_v61 = vsel %vm1165_vm5, %v1585_v60, -inf }
 0x640   : > { %1593 = vmax.xlane.f32.xlu2 %v1592_v61 }
 0x646   : > { %v1587_v62 = vpop.f32.mrf.mxu0 }
 0x649   : > { %v1562_v63 = vpop.f32.mrf.mxu3 }
 0x64a   : > { %v1589_v0 = vsel %vm1165_vm5, %v1562_v63, -inf }
 0x64b   : > { %1590 = vmax.xlane.f32.xlu0 %v1589_v0 }
 0x651   : > { %v1564_v1 = vpop.f32.mrf.mxu3 }
 0x6b1   : > { %v1466_v2 = vpop.xlane.xlu1 %1465 }
 0x6b2   : > { %2712 = vrcp.f32 %v1466_v2 }
 0x6b3   : > { %v1594_v3 = vpop.xlane.xlu2 %1593 }
 0x6b4   : > { %v1596_v4 = vsub.f32 %v1585_v60, %v1594_v3 }
 0x6b6   : > { %v1599_v48 = vmul.f32 1.442695, %v1596_v4 }
 0x6b8   : > { %v2713_v5 = vpop.eup %2712  ;;  %2714 = vpow2.f32 %v1599_v48 }
 0x6b9   : > { %v1470_v6 = vmul.f32 %v2713_v5, %v2711_v58  ;;  %v2537_v5 = vld [vmem:[%s3368_s29 + $0x18] sm:$0xff] }
 0x6ba   : > { %1792 = vmatpush.bf16.msrb.mxu0 %v2537_v5 }
 0x6bb   : > { %v1472_v7 = vpack.c.bf16 %v1470_v6, %v1470_v6  ;;  %v2536_v6 = vld [vmem:[%s3368_s29 + $0x10] sm:$0xff] }
 0x6bd   : > { %2429 = vmatmul.msk.bf16.vlgmr.msra.gmra.mxu1 %vm1165_vm5, %v1472_v7  ;;  %v2535_v7 = vld [vmem:[%s3368_s29 + $0x8] sm:$0xff] }
 0x6be   : > { %v2715_v8 = vpop.eup %2714  ;;  %v1591_v9 = vpop.xlane.xlu0 %1590  ;;  %1793 = vmatpush.bf16.msrb.mxu0 %v2536_v6 }
 0x6bf   : > { %v1595_v10 = vsub.f32 %v1562_v63, %v1591_v9  ;;  %v1604_v11 = vsel %vm1165_vm5, %v2715_v8, 0.0 }
 0x6c0   : > { %1605 = vadd.xlane.f32.xlu1 %v1604_v11  ;;  %v2534_v11 = vld [vmem:[%s3368_s29] sm:$0xff] }
 0x6c1   : > { %v1597_v12 = vmul.f32 1.442695, %v1595_v10 }
 0x6c2   : > { %1794 = vmatpush.bf16.msrb.mxu0 %v2535_v7 }
 0x6c3   : > { %2716 = vpow2.f32 %v1597_v12  ;;  %v2545_v12 = vld [vmem:[%s3407_s7 + $0x38] sm:$0xff] }
 0x6c6   : > { %1795 = vmatpush.bf16.msrb.mxu0 %v2534_v11 }
 0x6c9   : > { %v2717_v13 = vpop.eup %2716 }
 0x6ca   : > { %v1601_v14 = vsel %vm1165_vm5, %v2717_v13, 0.0 }
 0x6cb   : > { %1602 = vadd.xlane.f32.xlu0 %v1601_v14 }
 0x6d9   : > { %1634 = vrot.lane.b32.xlu1 %v3505_v54, %s3088_s16 }
 0x6df   : > { %1613 = vrot.lane.b32.xlu0 %v3484_v16, %s3088_s16 }
 0x733   : > { %v1606_v20 = vpop.xlane.xlu1 %1605 }
 0x734   : > { %2718 = vrcp.f32 %v1606_v20  ;;  %v2543_v20 = vld [vmem:[%s3407_s7 + $0x28] sm:$0xff] }
 0x73a   : > { %v1511_v18 = vpop.f32.mrf.mxu1  ;;  %v2719_v23 = vpop.eup %2718 }
 0x73b   : > { %v1515_v19 = vpack.c.bf16 %v1511_v18, %v1490_v47  ;;  %v1610_v24 = vmul.f32 %v2719_v23, %v2715_v8  ;;  %v1402_v47 = vadd.f32 %v1398_v17, %v1256_v45  ;;  %v2542_v23 = vld [vmem:[%s3407_s7 + $0x20] sm:$0xff]  ;;  %v2540_v45 = vld [vmem:[%s3407_s7 + $0x10] sm:$0xff] }
 0x73d   : > { %2434 = vmatmul.msk.bf16.vlgmr.msrb.gmra.mxu2 %vm1121_vm4, %v1515_v19  ;;  %v1612_v16 = vpack.c.bf16 %v1610_v24, %v1610_v24 }
 0x73e   : > { %v1603_v22 = vpop.xlane.xlu0 %1602 }
 0x73f   : > { %2720 = vrcp.f32 %v1603_v22 }
 0x742   : > { %v1513_v21 = vpop.f32.mrf.mxu1 }
 0x745   : > { %v2721_v26 = vpop.eup %2720 }
 0x746   : > { %v1609_v27 = vmul.f32 %v2721_v26, %v2717_v13 }
 0x748   : > { %v1611_v31 = vpack.c.bf16 %v1609_v27, %v1609_v27 }
 0x74b   : > { %v1635_v25 = vpop.permute.xlu1 %1634 }
 0x74c   : > { %v1640_v54 = vsel %vm1193_vm3, %v1635_v25, 0 }
 0x74d   : > { %1649 = vmatpush.bf16.msra.mxu2 %v1640_v54 }
 0x750   : > { %2438 = vmatmul.msk.bf16.vlgmr.msra.gmra.mxu2 %vm1165_vm5, %v1612_v16 }
 0x751   : > { %v1614_v28 = vpop.permute.xlu0 %1613 }
 0x752   : > { %v1619_v30 = vsel %vm1193_vm3, %v1614_v28, 0 }
 0x753   : > { %1628 = vmatpush.bf16.msrb.mxu1 %v1619_v30 }
 0x756   : > { %2437 = vmatmul.msk.bf16.vlgmr.msrb.gmra.mxu1 %vm1165_vm5, %v1611_v31  ;;  %v2682_v31 = vld [vmem:[%s953_s5] ss:$0 sm:$0xff] }
 0x757   : > { %1873 = vmatpush.bf16.msra.mxu1 %v2545_v12 }
 0x75b   : > { %1874 = vmatpush.bf16.msra.mxu1 %v2544_v15 }
 0x75f   : > { %1875 = vmatpush.bf16.msra.mxu1 %v2543_v20 }
 0x763   : > { %1876 = vmatpush.bf16.msra.mxu1 %v2542_v23 }
 0x7c0   : > { %v1536_v34 = vpop.f32.mrf.mxu2 }
 0x7c1   : > { %v1541_v36 = vadd.f32 %v1536_v34, %v1401_v57  ;;  %v3090_v57 = vmov 64.0  }
 0x7c2   : > { %2722 = vrcp.f32 %v3090_v57 }
 0x7c8   : > { %v1538_v37 = vpop.f32.mrf.mxu2  ;;  %v2723_v58 = vpop.eup %2722 }
 0x7c9   : > { %v1542_v51 = vadd.f32 %v1538_v37, %v1402_v47  ;;  %v1694_v59 = vmul.f32 64.0, %v2723_v58  ;;  %vm1698_vm6 = vweird.f32 %v2723_v58  ;;  %v2683_v37 = vld [vmem:[%s956_s17] ss:$0 sm:$0xff] }
 0x7ca   : > { %v2538_v47 = vld [vmem:[%s3407_s7] sm:$0xff] }
 0x7cb   : > { %v1695_v60 = vsub.f32 1.0, %v1694_v59  ;;  %v2685_v59 = vld [vmem:[%s950_s14] ss:$0 sm:$0xff]  ;;  %s3758_s14 = scalar_lea.vmem [#allocation14], %s3358_s22 }
 0x7cd   : > { %v1696_v35 = vmul.f32 %v2723_v58, %v1695_v60 }
 0x7d3   : > { %v1630_v38 = vpop.f32.mrf.mxu1  ;;  %v1651_v39 = vpop.f32.mrf.mxu2 }
 0x7d4   : > { %v1655_v40 = vpack.c.bf16 %v1651_v39, %v1630_v38 }
 0x7d6   : > { %2443 = vmatmul.msk.bf16.vlgmr.msrb.gmra.mxu3 %vm1121_vm4, %v1655_v40 }
 0x7db   : > { %v1632_v41 = vpop.f32.mrf.mxu1  ;;  %v1653_v43 = vpop.f32.mrf.mxu2 }
 0x859   : > { %v1676_v42 = vpop.f32.mrf.mxu3 }
 0x85a   : > { %v1681_v44 = vadd.f32 %v1676_v42, %v1541_v36 }
 0x85c   : > { %v1683_v46 = vadd.f32 %v1681_v44, %v3444_v29  ;;  %v1697_v29 = vadd.f32 %v2723_v58, %v1696_v35  ;;  %v2541_v44 = vld [vmem:[%s3407_s7 + $0x18] sm:$0xff] }
 0x85d   : > { %1877 = vmatpush.bf16.msra.mxu1 %v2541_v44 }
 0x85e   : > { %v1687_v50 = vsel %vm1076_vm2, %v1683_v46, 0.0  ;;  %v3573_v49 = vsel %vm1698_vm6, %v2723_v58, %v1697_v29 }
 0x85f   : > { %1688 = vadd.xlane.f32.xlu2 %v1687_v50 }
 0x861   : > { %v1678_v52 = vpop.f32.mrf.mxu3  ;;  %1878 = vmatpush.bf16.msra.mxu1 %v2540_v45 }
 0x862   : > { %v1682_v53 = vadd.f32 %v1678_v52, %v1542_v51  ;;  %v2684_v51 = vld [vmem:[%s3755_s24] ss:$0 sm:$0xff] }
 0x864   : > { %v1684_v55 = vadd.f32 %v1682_v53, %v3446_v32 }
 0x866   : > { %v1690_v56 = vsel %vm1076_vm2, %v1684_v55, 0.0 }
 0x867   : > { %1691 = vadd.xlane.f32.xlu2 %v1690_v56 }
 0x8d2   : > { %v1689_v61 = vpop.xlane.xlu2 %1688 }
 0x8d3   : > { %v1700_v62 = vmul.f32 %v3573_v49, %v1689_v61 }
 0x8d5   : > { %v1702_v32 = vsub.f32 %v1683_v46, %v1700_v62  ;;  %v2539_v46 = vld [vmem:[%s3407_s7 + $0x8] sm:$0xff]  ;;  %s3757_s7 = scalar_lea.vmem [#allocation12], %s3358_s22 }
 0x8d6   : > { %1879 = vmatpush.bf16.msra.mxu1 %v2539_v46 }
 0x8d7   : > { %v1704_v63 = vmul.f32 %v1702_v32, %v1702_v32 }
 0x8d9   : > { %v1706_v0 = vsel %vm1076_vm2, %v1704_v63, 0.0 }
 0x8da   : > { %1707 = vadd.xlane.f32.xlu1 %v1706_v0  ;;  %v1692_v1 = vpop.xlane.xlu2 %1691  ;;  %1880 = vmatpush.bf16.msra.mxu1 %v2538_v47 }
 0x8db   : > { %v1701_v2 = vmul.f32 %v3573_v49, %v1692_v1 }
 0x8dd   : > { %v1703_v3 = vsub.f32 %v1684_v55, %v1701_v2 }
 0x8df   : > { %v1705_v4 = vmul.f32 %v1703_v3, %v1703_v3 }
 0x8e1   : > { %v1709_v48 = vsel %vm1076_vm2, %v1705_v4, 0.0 }
 0x8e2   : > { %1710 = vadd.xlane.f32.xlu0 %v1709_v48 }
 0x94d   : > { %v1708_v8 = vpop.xlane.xlu1 %1707 }
 0x94e   : > { %v1712_v9 = vmul.f32 %v1708_v8, %v3573_v49 }
 0x950   : > { %v1714_v10 = vadd.f32 1e-05, %v1712_v9 }
 0x952   : > { %2724 = vrsqrt.f32 %v1714_v10  ;;  %vm1722_vm8 = vweird.f32 %v1714_v10 }
 0x955   : > { %v1711_v13 = vpop.xlane.xlu0 %1710 }
 0x956   : > { %v1713_v14 = vmul.f32 %v1711_v13, %v3573_v49 }
 0x958   : > { %v2725_v17 = vpop.eup %2724  ;;  %v1715_v18 = vadd.f32 1e-05, %v1713_v14 }
 0x959   : > { %v1717_v19 = vmul.f32 %v2725_v17, %v1714_v10  ;;  %vm1723_vm7 = vweird.f32 %v2725_v17 }
 0x95a   : > { %2726 = vrsqrt.f32 %v1715_v18  ;;  %vm1724_vm9 = vmor %vm1722_vm8, %vm1723_vm7  ;;  %vm1732_vm11 = vweird.f32 %v1715_v18 }
 0x95b   : > { %v1718_v21 = vmul.f32 %v2725_v17, %v1717_v19 }
 0x95d   : > { %v1719_v22 = vmul.f32 0.5, %v1718_v21 }
 0x95f   : > { %v1720_v24 = vsub.f32 1.5, %v1719_v22 }
 0x960   : > { %v2727_v25 = vpop.eup %2726 }
 0x961   : > { %v1721_v54 = vmul.f32 %v2725_v17, %v1720_v24  ;;  %v1727_v26 = vmul.f32 %v2727_v25, %v1715_v18  ;;  %vm1733_vm10 = vweird.f32 %v2727_v25 }
 0x962   : > { %vm1734_vm12 = vmor %vm1732_vm11, %vm1733_vm10 }
 0x963   : > { %v1728_v16 = vmul.f32 %v2727_v25, %v1727_v26  ;;  %v1725_v27 = vsel %vm1724_vm9, %v2725_v17, %v1721_v54 }
 0x964   : > { %v1736_v33 = vmul.f32 %v1725_v27, %v1702_v32  ;;  %v2687_v27 = vld [vmem:[%s3758_s14] ss:$0 sm:$0xff] }
 0x965   : > { %v1729_v28 = vmul.f32 0.5, %v1728_v16 }
 0x966   : > { %v1741_v38 = vmul.f32 %v2682_v31, %v1736_v33 }
 0x967   : > { %v1730_v30 = vsub.f32 1.5, %v1729_v28 }
 0x968   : > { %v1746_v41 = vadd.f32 %v2683_v37, %v1741_v38 }
 0x969   : > { %v1731_v34 = vmul.f32 %v2727_v25, %v1730_v30 }
 0x96b   : > { %v1735_v36 = vsel %vm1734_vm12, %v2727_v25, %v1731_v34  ;;  %v2686_v25 = vld [vmem:[%s3757_s7] ss:$0 sm:$0xff] }
 0x96c   : > { %v1737_v39 = vmul.f32 %v1735_v36, %v1703_v3 }
 0x96e   : > { %v1742_v40 = vmul.f32 %v2682_v31, %v1737_v39 }
 0x970   : > { %v1747_v43 = vadd.f32 %v2683_v37, %v1742_v40 }
 0x972   : > { %v1748_v42 = vpack.c.bf16 %v1747_v43, %v1746_v41 }
 0x974   : > { %2460 = vmatmul.msk.bf16.vlgmr.msrb.gmra.mxu0 %vm1076_vm2, %v1748_v42 }
 0x9f1   : > { %v1797_v50 = vpop.f32.mrf.mxu0 }
 0x9f2   : > { %v1798_v52 = vadd.f32 %v2684_v51, %v1797_v50 }
 0x9f4   : > { %v1802_v56 = vmax.f32 %v1798_v52, 0.0 }
 0x9f9   : > { %v1799_v53 = vpop.f32.mrf.mxu0 }
 0x9fa   : > { %v1800_v55 = vadd.f32 %v2684_v51, %v1799_v53 }
 0x9fc   : > { %v1803_v57 = vmax.f32 %v1800_v55, 0.0 }
 0x9fe   : > { %v1804_v58 = vpack.c.bf16 %v1803_v57, %v1802_v56 }
 0xa00   : > { %1881 = vmatmul.bf16.vlgmr.msra.gmra.mxu1 %v1804_v58 }
 0xa7d   : > { %v1882_v60 = vpop.f32.mrf.mxu1 }
 0xa7e   : > { %v1883_v35 = vadd.f32 %v2685_v59, %v1882_v60 }
 0xa80   : > { %v1887_v29 = vadd.f32 %v1883_v35, %v1746_v41 }
 0xa82   : > { %v1891_v61 = vsel %vm1076_vm2, %v1887_v29, 0.0 }
 0xa83   : > { %1892 = vadd.xlane.f32.xlu2 %v1891_v61 }
 0xa85   : > { %v1884_v62 = vpop.f32.mrf.mxu1 }
 0xa86   : > { %v1885_v32 = vadd.f32 %v2685_v59, %v1884_v62 }
 0xa88   : > { %v1888_v63 = vadd.f32 %v1885_v32, %v1747_v43 }
 0xa8a   : > { %v1894_v0 = vsel %vm1076_vm2, %v1888_v63, 0.0 }
 0xa8b   : > { %1895 = vadd.xlane.f32.xlu2 %v1894_v0 }
 0xaf6   : > { %v1893_v1 = vpop.xlane.xlu2 %1892 }
 0xaf7   : > { %v1897_v2 = vmul.f32 %v1893_v1, %v3573_v49 }
 0xaf9   : > { %v1899_v3 = vsub.f32 %v1887_v29, %v1897_v2  ;;  %v2688_v2 = vld [vmem:[%s959_s18] ss:$0 sm:$0xff] }
 0xafb   : > { %v1901_v4 = vmul.f32 %v1899_v3, %v1899_v3 }
 0xafd   : > { %v1903_v48 = vsel %vm1076_vm2, %v1901_v4, 0.0  ;;  %v2689_v4 = vld [vmem:[%s962_s23] ss:$0 sm:$0xff]  ;;  %s3761_s23 = sld [smem:[#allocation47_spill]] (!%p2493_p3) }
 0xafe   : > { %1904 = vadd.xlane.f32.xlu2 %v1903_v48  ;;  %v1896_v5 = vpop.xlane.xlu2 %1895 }
 0xaff   : > { %v1898_v6 = vmul.f32 %v1896_v5, %v3573_v49 }
 0xb01   : > { %v1900_v7 = vsub.f32 %v1888_v63, %v1898_v6 }
 0xb03   : > { %v1902_v8 = vmul.f32 %v1900_v7, %v1900_v7 }
 0xb05   : > { %v1906_v9 = vsel %vm1076_vm2, %v1902_v8, 0.0 }
 0xb06   : > { %1907 = vadd.xlane.f32.xlu2 %v1906_v9 }
 0xb71   : > { %v1905_v10 = vpop.xlane.xlu2 %1904 }
 0xb72   : > { %v1909_v11 = vmul.f32 %v1905_v10, %v3573_v49 }
 0xb74   : > { %v1911_v12 = vadd.f32 1e-05, %v1909_v11 }
 0xb76   : > { %2728 = vrsqrt.f32 %v1911_v12  ;;  %vm1919_vm14 = vweird.f32 %v1911_v12 }
 0xb79   : > { %v1908_v13 = vpop.xlane.xlu2 %1907 }
 0xb7a   : > { %v1910_v14 = vmul.f32 %v1908_v13, %v3573_v49 }
 0xb7c   : > { %v2729_v15 = vpop.eup %2728  ;;  %v1912_v17 = vadd.f32 1e-05, %v1910_v14 }
 0xb7d   : > { %v1914_v18 = vmul.f32 %v2729_v15, %v1911_v12  ;;  %vm1920_vm13 = vweird.f32 %v2729_v15 }
 0xb7e   : > { %2730 = vrsqrt.f32 %v1912_v17  ;;  %vm1921_vm15 = vmor %vm1919_vm14, %vm1920_vm13  ;;  %vm1929_vm1 = vweird.f32 %v1912_v17 }
 0xb7f   : > { %v1915_v19 = vmul.f32 %v2729_v15, %v1914_v18 }
 0xb81   : > { %v1916_v20 = vmul.f32 0.5, %v1915_v19 }
 0xb83   : > { %v1917_v21 = vsub.f32 1.5, %v1916_v20 }
 0xb84   : > { %v2731_v22 = vpop.eup %2730 }
 0xb85   : > { %v1918_v23 = vmul.f32 %v2729_v15, %v1917_v21  ;;  %v1924_v24 = vmul.f32 %v2731_v22, %v1912_v17  ;;  %vm1930_vm0 = vweird.f32 %v2731_v22 }
 0xb86   : > { %vm1931_vm3 = vmor %vm1929_vm1, %vm1930_vm0 }
 0xb87   : > { %v1925_v54 = vmul.f32 %v2731_v22, %v1924_v24  ;;  %v1922_v26 = vsel %vm1921_vm15, %v2729_v15, %v1918_v23 }
 0xb88   : > { %v1933_v16 = vmul.f32 %v1922_v26, %v1899_v3 }
 0xb89   : > { %v1926_v28 = vmul.f32 0.5, %v1925_v54 }
 0xb8a   : > { %v1938_v30 = vmul.f32 %v2686_v25, %v1933_v16 }
 0xb8b   : > { %v1927_v31 = vsub.f32 1.5, %v1926_v28 }
 0xb8c   : > { %v1943_v33 = vadd.f32 %v2687_v27, %v1938_v30 }
 0xb8d   : > { %v1928_v34 = vmul.f32 %v2731_v22, %v1927_v31 }
 0xb8e   : > { %v1947_v36 = vsel %vm1076_vm2, %v1943_v33, 0.0 }
 0xb8f   : > { %1948 = vadd.xlane.f32.xlu2 %v1947_v36  ;;  %v1932_v37 = vsel %vm1931_vm3, %v2731_v22, %v1928_v34 }
 0xb90   : > { %v1934_v38 = vmul.f32 %v1932_v37, %v1900_v7 }
 0xb92   : > { %v1939_v39 = vmul.f32 %v2686_v25, %v1934_v38 }
 0xb94   : > { %v1944_v40 = vadd.f32 %v2687_v27, %v1939_v39 }
 0xb96   : > { %v1950_v41 = vsel %vm1076_vm2, %v1944_v40, 0.0 }
 0xb97   : > { %1951 = vadd.xlane.f32.xlu1 %v1950_v41 }
 0xc02   : > { %v1949_v43 = vpop.xlane.xlu2 %1948 }
 0xc03   : > { %v1953_v42 = vmul.f32 %v1949_v43, %v3573_v49 }
 0xc05   : > { %v1955_v44 = vsub.f32 %v1943_v33, %v1953_v42 }
 0xc07   : > { %v1957_v45 = vmul.f32 %v1955_v44, %v1955_v44 }
 0xc09   : > { %v1959_v46 = vsel %vm1076_vm2, %v1957_v45, 0.0 }
 0xc0a   : > { %v1952_v47 = vpop.xlane.xlu1 %1951  ;;  %1960 = vadd.xlane.f32.xlu2 %v1959_v46 }
 0xc0b   : > { %v1954_v50 = vmul.f32 %v1952_v47, %v3573_v49 }
 0xc0d   : > { %v1956_v51 = vsub.f32 %v1944_v40, %v1954_v50 }
 0xc0f   : > { %v1958_v52 = vmul.f32 %v1956_v51, %v1956_v51 }
 0xc11   : > { %v1962_v53 = vsel %vm1076_vm2, %v1958_v52, 0.0 }
 0xc12   : > { %1963 = vadd.xlane.f32.xlu0 %v1962_v53 }
 0xc7d   : > { %v1961_v55 = vpop.xlane.xlu2 %1960 }
 0xc7e   : > { %v1965_v56 = vmul.f32 %v1961_v55, %v3573_v49 }
 0xc80   : > { %v1967_v57 = vadd.f32 1e-05, %v1965_v56 }
 0xc82   : > { %2732 = vrsqrt.f32 %v1967_v57  ;;  %vm1975_vm5 = vweird.f32 %v1967_v57 }
 0xc85   : > { %v1964_v58 = vpop.xlane.xlu0 %1963 }
 0xc86   : > { %v1966_v59 = vmul.f32 %v1964_v58, %v3573_v49 }
 0xc88   : > { %v2733_v60 = vpop.eup %2732  ;;  %v1968_v35 = vadd.f32 1e-05, %v1966_v59 }
 0xc89   : > { %v1970_v29 = vmul.f32 %v2733_v60, %v1967_v57  ;;  %vm1976_vm4 = vweird.f32 %v2733_v60 }
 0xc8a   : > { %2734 = vrsqrt.f32 %v1968_v35  ;;  %vm1977_vm6 = vmor %vm1975_vm5, %vm1976_vm4  ;;  %vm1985_vm8 = vweird.f32 %v1968_v35 }
 0xc8b   : > { %v1971_v61 = vmul.f32 %v2733_v60, %v1970_v29 }
 0xc8d   : > { %v1972_v62 = vmul.f32 0.5, %v1971_v61 }
 0xc8f   : > { %v1973_v32 = vsub.f32 1.5, %v1972_v62 }
 0xc90   : > { %v2735_v63 = vpop.eup %2734 }
 0xc91   : > { %v1974_v0 = vmul.f32 %v2733_v60, %v1973_v32  ;;  %v1980_v1 = vmul.f32 %v2735_v63, %v1968_v35  ;;  %vm1986_vm7 = vweird.f32 %v2735_v63 }
 0xc92   : > { %vm1987_vm9 = vmor %vm1985_vm8, %vm1986_vm7 }
 0xc93   : > { %v1978_v49 = vsel %vm1977_vm6, %v2733_v60, %v1974_v0  ;;  %v1981_v3 = vmul.f32 %v2735_v63, %v1980_v1 }
 0xc94   : > { %v1989_v48 = vmul.f32 %v1978_v49, %v1955_v44 }
 0xc95   : > { %v1982_v5 = vmul.f32 0.5, %v1981_v3 }
 0xc96   : > { %v1994_v6 = vmul.f32 %v2688_v2, %v1989_v48 }
 0xc97   : > { %v1983_v7 = vsub.f32 1.5, %v1982_v5 }
 0xc98   : > { %v1999_v8 = vadd.f32 %v2689_v4, %v1994_v6 }
 0xc99   : > { %v1984_v9 = vmul.f32 %v2735_v63, %v1983_v7 }
 0xc9a   : > { %2001 = vst.msk [vmem:[#allocation2] sm:$0xff] %vm1076_vm2, %v1999_v8 }
 0xc9b   : > { %v1988_v10 = vsel %vm1987_vm9, %v2735_v63, %v1984_v9 }
 0xc9c   : > { %v1990_v11 = vmul.f32 %v1988_v10, %v1956_v51 }
 0xc9e   : > { %v1995_v12 = vmul.f32 %v2688_v2, %v1990_v11  ;;  %2006 = sbr.rel (%p2493_p3) target bundleno = 3388 (0xd3c), region = 136 }
 0xca0   : > { %v2000_v13 = vadd.f32 %v2689_v4, %v1995_v12 }
 0xca2   : > { %2002 = vst.msk [vmem:[#allocation2 + $0x8] sm:$0xff] %vm1076_vm2, %v2000_v13 }
 0xca3   : > { %v2549_v14 = vld [vmem:[#allocation15 + $0x18] sm:$0xff]  ;;  %v2548_v15 = vld [vmem:[#allocation15 + $0x10] sm:$0xff]  ;;  %v2547_v17 = vld [vmem:[#allocation15 + $0x8] sm:$0xff]  ;;  %v2007_v19 = vpack.c.bf16 %v2000_v13, %v1999_v8 }
 0xca4   : > { %2051 = vmatpush.bf16.msra.mxu0 %v2549_v14  ;;  %v2546_v18 = vld [vmem:[#allocation15] sm:$0xff]  ;;  %v2736_v20 = vld [vmem:[%s3761_s23] ss:$0 sm:$0xff] }
 0xca8   : > { %2052 = vmatpush.bf16.msra.mxu0 %v2548_v15 }
 0xcac   : > { %2053 = vmatpush.bf16.msra.mxu0 %v2547_v17 }
 0xcb0   : > { %2054 = vmatpush.bf16.msra.mxu0 %v2546_v18 }
 0xcb3   : > { %2510 = vmatmul.msk.bf16.vlgmr.msra.gmra.mxu0 %vm1076_vm2, %v2007_v19 }
 0xd30   : > { %v2056_v21 = vpop.f32.mrf.mxu0 }
 0xd31   : > { %v2057_v22 = vadd.f32 %v2736_v20, %v2056_v21 }
 0xd33   : > { %2061 = vst [vmem:[#allocation17] sm:$0xff] %v2057_v22 }
 0xd38   : > { %v2058_v23 = vpop.f32.mrf.mxu0 }
 0xd39   : > { %v2059_v24 = vadd.f32 %v2736_v20, %v2058_v23 }
 0xd3b   : > { %2062 = vst [vmem:[#allocation17 + $0x8] sm:$0xff] %v2059_v24 }
 0xd3c PF: > { %s3762_s21 = sld [smem:[#allocation28_spill]]  ;;  %s3091_s0 = smov [#allocation17]  }
 0xd3d   : > { %s3763_s4 = sld [smem:[#allocation48_spill]]  ;;  %s2071_s29 = sshll.u32 %s3091_s0, 4  ;;  %s2072_s29 = int_to_ptr.vmem [resolvable:$true] %s2071_s29 }
 0xd3e   : > { %s3092_s20 = smov 128   ;;  %s3093_s9 = smov 8  }
 0xd42   : > { %p2613_p4 = scmp.eq.s32.totalorder %s3762_s21, 1 }
 0xd43   : > { %s2073_s28 = sshll.u32 %s3763_s4, 4  ;;  %s2074_s28 = int_to_ptr.hbm [resolvable:$true] %s2073_s28 }
 0xd44   : > { %2575 = dma.vmem_to_hbm [thread:$0]  (%p2613_p4), %s2072_s29, 256, %s2074_s28, [#allocation5], %s3092_s20, %s3092_s20, %s3093_s9  }
 0xd45   : > { %3050 = dma.done.wait (%p2613_p4), [#allocation5], 256  }
 0xd46   : > { %3052 = vsyncadd (%p2613_p4), [#allocation5], 4294967040 }
 0xd47 PF: > { %s3764_s3 = sld [smem:[#allocation27_spill]] }
 0xd48   : > { %s3765_s0 = sld [smem:[#allocation24_spill]] }
 0xd49   : > { %s3766_s30 = sld [smem:[#allocation25_spill]] }
 0xd4a   : > { %s3767_s20 = sld [smem:[#allocation30_spill]] }
 0xd4b   : > { %s3768_s21 = sld [smem:[#allocation26_spill]] }
 0xd4c   : > { %s3769_s1 = sld [smem:[#allocation29_spill]] }
 0xd4d   : > { %s39_s22 = sadd.s32 1, %s3764_s3  }
 0xd4e   : > { %p36_p5 = scmp.ge.s32.totalorder %s39_s22, 4  }
 0xd50   :  { %38 = sbr.rel (!%p36_p5) target bundleno = 29 (0x1d), region = 225 }
 0xd55   :  { %2090 = vsyncpa [#allocation4], 1 }
 0xd56   :  { %2092 = vsyncpa [#allocation4 + $0x1], 1 }
 0xd57   :  { %2093 = vsyncpa [#allocation7], 1 }
 0xd58   :  { %2094 = vsyncpa [#allocation10], 1 }
 0xd59   :  { %2096 = vsyncpa [#allocation10 + $0x1], 1 }
 0xd5a   :  { %2097 = vsyncpa [#allocation13], 1 }
 0xd5b   :  { %2099 = vsyncpa [#allocation13 + $0x1], 1 }
 0xd5c   :  { %2100 = vsyncpa [#allocation16], 1 }
 0xd5d   :  { %2101 = vsyncpa [#allocation5], 1 }
 0xd5e   :  { %2103 = vsyncpa [#allocation5 + $0x1], 1 }

</bundles_post_ra>
